<compile_context>
chip_gen: v7x
topology: tpu7x:2x2x1
jax: 0.10.0
libtpu: 0.0.40
codegen_flags: <defaults>
</compile_context>

<pallas_src>
import jax
import jax.numpy as jnp
from jax.experimental import pallas as pl
from jax.experimental.pallas import tpu as pltpu


C_RGB, C_D, C_HID = 16, 8, 16
SEGM_LAYERS = ["layer2"]


# ----------------------------------------------------------------------------
# Pallas kernels
# ----------------------------------------------------------------------------
def _matmul_bias_relu_kernel(x_ref, w_ref, b_ref, o_ref):
    """(B*P, K) @ (K, N) + bias, ReLU.  Batch is folded into the row dim."""
    x = x_ref[...].astype(jnp.bfloat16)              # bf16 feeds the MXU
    y = jnp.dot(x, w_ref[...], preferred_element_type=jnp.float32)
    y = jnp.maximum(y + b_ref[...], 0.0)             # f32 VPU epilogue
    o_ref[...] = y.astype(o_ref.dtype)


def _segm_head_kernel(ft_ref, fr_ref, d_ref, m_ref, dist_ref,
                      w_sim_ref, w_d_ref, w_dist_ref, b1_ref,
                      w2_ref, b2_ref, o_ref):
    """Fused segm predictor for one batch element.

    ft, fr : (P, C) test / train RGB features
    d      : (P, C_D) test depth features
    m      : (P, 2) [fg, bg] train mask posteriors
    dist   : (P, 1) distance map
    Computes cosine-similarity matching + mask-weighted mean + 1x1-conv head.
    All intermediates stay on-chip; output written as a lane-dense (1, P) row.
    """
    ft = ft_ref[...]                                                  # (P, C) f32
    fr = fr_ref[...]

    # normalize test features; fold the train-feature norm into the mask columns
    inv_ft = jax.lax.rsqrt(jnp.sum(ft * ft, axis=-1, keepdims=True) + 1e-6)
    inv_fr = jax.lax.rsqrt(jnp.sum(fr * fr, axis=-1, keepdims=True) + 1e-6)
    ft_n = (ft * inv_ft).astype(jnp.bfloat16)
    fr_b = fr.astype(jnp.bfloat16)

    # cosine similarity (P, P) on the MXU, f32 accumulation
    s = jax.lax.dot_general(ft_n, fr_b, (((1,), (1,)), ((), ())),
                            preferred_element_type=jnp.float32)       # (P, P)

    m = m_ref[...]                                                    # (P, 2)
    denom = jnp.sum(m, axis=0, keepdims=True) + 1e-6                  # (1, 2)
    m_scaled = m * inv_fr                                             # diag(1/|fr|) @ m
    sim = jnp.dot(s, m_scaled, preferred_element_type=jnp.float32) / denom  # (P, 2)

    # 1x1-conv head: split-weight form of concat([sim, d, dist], -1) @ h1_w
    d = d_ref[...]                                                    # (P, C_D)
    dist = dist_ref[...]                                              # (P, 1)
    hid = (jnp.dot(sim, w_sim_ref[...], preferred_element_type=jnp.float32)
           + jnp.dot(d, w_d_ref[...], preferred_element_type=jnp.float32)
           + dist * w_dist_ref[...]                                   # outer product
           + b1_ref[...])
    hid = jnp.maximum(hid, 0.0)                                       # (P, C_HID)

    # final 1-channel projection, emitted lane-dense as a (1, P) row
    out_row = jax.lax.dot_general(w2_ref[...], hid, (((1,), (1,)), ((), ())),
                                  preferred_element_type=jnp.float32)  # (1, P)
    o_ref[0] = out_row + b2_ref[...]


# ----------------------------------------------------------------------------
# Pallas wrappers
# ----------------------------------------------------------------------------
def pallas_conv_matmul(patches, w_flat, b_row):
    """patches: (BM, K) f32, w_flat: (K, N) bf16, b_row: (1, N) f32 -> (BM, N) f32."""
    BM, K = patches.shape
    N = w_flat.shape[1]
    return pl.pallas_call(
        _matmul_bias_relu_kernel,
        out_shape=jax.ShapeDtypeStruct((BM, N), jnp.float32),
        grid=(1,),
        in_specs=[
            pl.BlockSpec((BM, K), lambda i: (0, 0)),
            pl.BlockSpec((K, N), lambda i: (0, 0)),
            pl.BlockSpec((1, N), lambda i: (0, 0)),
        ],
        out_specs=pl.BlockSpec((BM, N), lambda i: (0, 0)),
        compiler_params=pltpu.CompilerParams(dimension_semantics=("arbitrary",)),
    )(patches, w_flat, b_row)


def pallas_segm_predictor_head(rgb_feats, d_test, masks_fgbg, dist, dp, B, P):
    """Fused predictor.  rgb_feats: (2B*P, C) = [train | test] features."""
    C = rgb_feats.shape[-1]
    CD = d_test.shape[-1]
    CH = dp["h1_b"].shape[-1]

    flops = B * (2 * P * P * C          # similarity matmul
                 + 2 * P * P * 2        # mask-weighted pooling
                 + 2 * P * (2 + CD + 1) * CH
                 + 2 * P * CH)
    bytes_accessed = 4 * (2 * B * P * C + B * P * CD + B * P * 3 + B * P)
    cost = pl.CostEstimate(flops=flops, transcendentals=2 * B * P,
                           bytes_accessed=bytes_accessed)

    return pl.pallas_call(
        _segm_head_kernel,
        out_shape=jax.ShapeDtypeStruct((B, 1, P), jnp.float32),
        grid=(B,),
        in_specs=[
            pl.BlockSpec((P, C), lambda i: (B + i, 0)),    # test RGB features
            pl.BlockSpec((P, C), lambda i: (i, 0)),        # train RGB features
            pl.BlockSpec((P, CD), lambda i: (i, 0)),       # test depth features
            pl.BlockSpec((P, 2), lambda i: (i, 0)),        # [fg, bg] masks
            pl.BlockSpec((P, 1), lambda i: (i, 0)),        # dist map
            pl.BlockSpec((2, CH), lambda i: (0, 0)),       # h1 weight (sim part)
            pl.BlockSpec((CD, CH), lambda i: (0, 0)),      # h1 weight (depth part)
            pl.BlockSpec((1, CH), lambda i: (0, 0)),       # h1 weight (dist part)
            pl.BlockSpec((1, CH), lambda i: (0, 0)),       # h1 bias
            pl.BlockSpec((1, CH), lambda i: (0, 0)),       # h2 weight (row form)
            pl.BlockSpec((1, 1), lambda i: (0, 0)),        # h2 bias
        ],
        out_specs=pl.BlockSpec((1, 1, P), lambda i: (i, 0, 0)),
        compiler_params=pltpu.CompilerParams(dimension_semantics=("parallel",)),
        cost_estimate=cost,
    )(rgb_feats, rgb_feats, d_test, masks_fgbg, dist,
      dp["h1w_sim"], dp["h1w_d"], dp["h1w_dist"], dp["h1_b"],
      dp["h2w_row"], dp["h2_b"])


# ----------------------------------------------------------------------------
# Glue: im2col / pooling / parameter prep (plain JAX, fused by XLA under jit)
# ----------------------------------------------------------------------------
def im2col_3x3_s2_nhwc(x):
    """x: (B, H, W, C) -> patches (B*P, Kpad), K order = (kh, kw, C), pad K to 8."""
    k, stride, pad = 3, 2, 1
    x = jnp.pad(x, ((0, 0), (pad, pad), (pad, pad), (0, 0)))
    B, H, W, C = x.shape
    Ho = (H - k) // stride + 1
    Wo = (W - k) // stride + 1
    cols = []
    for i in range(k):
        for j in range(k):
            cols.append(x[:, i:i + stride * Ho:stride, j:j + stride * Wo:stride, :])
    p = jnp.stack(cols, axis=3)                      # (B, Ho, Wo, 9, C)
    K = k * k * C
    p = p.reshape(B * Ho * Wo, K)
    Kpad = ((K + 7) // 8) * 8
    if Kpad != K:
        p = jnp.pad(p, ((0, 0), (0, Kpad - K)))
    return p, Ho, Wo


def avgpool2x2(x):
    """x: (B, C, H, W) -> (B, C, H/2, W/2)."""
    B, C, H, W = x.shape
    return x.reshape(B, C, H // 2, 2, W // 2, 2).mean(axis=(3, 5))


def conv3x3_s2_relu(x_nhwc, w_flat, b_row):
    """3x3 stride-2 conv + ReLU, channels-last in/out.  Returns ((B*P, Cout), Ho, Wo)."""
    patches, Ho, Wo = im2col_3x3_s2_nhwc(x_nhwc)
    return pallas_conv_matmul(patches, w_flat, b_row), Ho, Wo


def init_params(key):
    ks = jax.random.split(key, 6)
    scale = 0.1
    return {
        "rgb_w": scale * jax.random.normal(ks[0], (C_RGB, 3, 3, 3), jnp.float32),
        "rgb_b": jnp.zeros((C_RGB,), jnp.float32),
        "d_w": scale * jax.random.normal(ks[1], (C_D, 1, 3, 3), jnp.float32),
        "d_b": jnp.zeros((C_D,), jnp.float32),
        # head input = [fg_sim, bg_sim] (2) + depth feat (C_D) + dist map (1)
        "h1_w": scale * jax.random.normal(ks[2], (2 + C_D + 1, C_HID), jnp.float32),
        "h1_b": jnp.zeros((C_HID,), jnp.float32),
        "h2_w": scale * jax.random.normal(ks[3], (C_HID, 1), jnp.float32),
        "h2_b": jnp.zeros((1,), jnp.float32),
    }


def prepare_params(params):
    """One-time: flatten / pad / pre-cast weights so nothing is rebuilt per call."""
    def flat_conv_w(w):                               # (Cout, Cin, kh, kw)
        cout, cin, kh, kw = w.shape
        wf = jnp.transpose(w, (2, 3, 1, 0)).reshape(kh * kw * cin, cout)
        kpad = ((wf.shape[0] + 7) // 8) * 8
        if kpad != wf.shape[0]:
            wf = jnp.pad(wf, ((0, kpad - wf.shape[0]), (0, 0)))
        return wf.astype(jnp.bfloat16)                # MXU operand, pre-cast once

    h1 = params["h1_w"]
    return {
        "rgb_w": flat_conv_w(params["rgb_w"]),
        "rgb_b": params["rgb_b"].reshape(1, -1),
        "d_w": flat_conv_w(params["d_w"]),
        "d_b": params["d_b"].reshape(1, -1),
        "h1w_sim": h1[0:2],                           # (2, C_HID)
        "h1w_d": h1[2:2 + C_D],                       # (C_D, C_HID)
        "h1w_dist": h1[2 + C_D:2 + C_D + 1],          # (1, C_HID)
        "h1_b": params["h1_b"].reshape(1, -1),
        "h2w_row": params["h2_w"].T,                  # (1, C_HID)
        "h2_b": params["h2_b"].reshape(1, 1),
    }


# ----------------------------------------------------------------------------
# DepthSegmNet.forward (mirrors the PyTorch wrapper)
# ----------------------------------------------------------------------------
def depth_segm_net_forward(dp, train_colors, train_depths, test_colors,
                           test_depths, train_masks, test_dist=None):
    B = train_colors.shape[0]

    # RGB backbone ('layer2') on train + test frames in ONE call (shared weights,
    # batch folded into matmul rows).
    colors = jnp.concatenate([train_colors, test_colors], axis=0)      # (2B,3,H,W)
    colors = jnp.transpose(colors, (0, 2, 3, 1))                       # NHWC once
    rgb_feats, h, w = conv3x3_s2_relu(colors, dp["rgb_w"], dp["rgb_b"])  # (2B*P, C_RGB)
    P = h * w

    # segm_predictor.depth_feat_extractor on the test frame.
    # TODO(synk): PyTorch also runs it on train_depths, but the (synthetic)
    # segm_predictor never consumes train depth features; dead work is skipped.
    d_nhwc = jnp.transpose(test_depths, (0, 2, 3, 1))
    d_test, _, _ = conv3x3_s2_relu(d_nhwc, dp["d_w"], dp["d_b"])       # (B*P, C_D)

    # mask / dist maps downsampled to feature resolution, channels-last flat.
    mask_ds = avgpool2x2(train_masks).reshape(B * P, 1)
    masks_fgbg = jnp.concatenate([mask_ds, 1.0 - mask_ds], axis=-1)    # (B*P, 2)
    if test_dist is not None:
        dist_ds = avgpool2x2(test_dist).reshape(B * P, 1)
    else:
        dist_ds = jnp.zeros((B * P, 1), jnp.float32)

    # Fused: similarity matching + mask-weighted pooling + 2-layer 1x1-conv head.
    out = pallas_segm_predictor_head(rgb_feats, d_test, masks_fgbg, dist_ds,
                                     dp, B, P)                         # (B, 1, P)
    return out.reshape(B, 1, h, w)                                     # NCHW logits


# ----------------------------------------------------------------------------
if __name__ == "__main__":
    key = jax.random.PRNGKey(0)
    ks = jax.random.split(key, 7)
    B, H, W = 2, 16, 16

    train_colors = jax.random.normal(ks[0], (B, 3, H, W), jnp.float32)
    test_colors = jax.random.normal(ks[1], (B, 3, H, W), jnp.float32)
    train_depths = jax.random.normal(ks[2], (B, 1, H, W), jnp.float32)
    test_depths = jax.random.normal(ks[3], (B, 1, H, W), jnp.float32)
    train_masks = (jax.random.uniform(ks[4], (B, 1, H, W)) > 0.5).astype(jnp.float32)
    test_dist = jax.random.uniform(ks[5], (B, 1, H, W), dtype=jnp.float32)

    params = init_params(ks[6])
    dp = prepare_params(params)

    fwd = jax.jit(depth_segm_net_forward)
    out = fwd(dp, train_colors, train_depths, test_colors, test_depths,
              train_masks, test_dist)
    jax.block_until_ready(out)
    assert out.shape == (B, 1, H // 2, W // 2)
    print("KERNEL_OK")
</pallas_src>

<mosaic_0001>
module attributes {stable_mosaic.version = 11 : i64} {
  func.func @_matmul_bias_relu_kernel(%arg0: i32, %arg1: memref<256x32xf32, #tpu.memory_space<vmem>>, %arg2: memref<32x16xbf16, #tpu.memory_space<vmem>>, %arg3: memref<1x16xf32, #tpu.memory_space<vmem>>, %arg4: memref<256x16xf32, #tpu.memory_space<vmem>>) attributes {dimension_semantics = [#tpu.dimension_semantics<arbitrary>], iteration_bounds = array<i64: 1>, scalar_prefetch = 0 : i64, scratch_operands = 0 : i64, tpu.core_type = #tpu.core_type<tc>, window_params = [{pipeline_mode = #tpu.pipeline_mode<synchronous>, transform_indices = @transform_0, window_bounds = array<i64: 256, 32>}, {pipeline_mode = #tpu.pipeline_mode<synchronous>, transform_indices = @transform_1, window_bounds = array<i64: 32, 16>}, {pipeline_mode = #tpu.pipeline_mode<synchronous>, transform_indices = @transform_2, window_bounds = array<i64: 1, 16>}, {pipeline_mode = #tpu.pipeline_mode<synchronous>, transform_indices = @transform_3, window_bounds = array<i64: 256, 16>}]} {
    %c0 = arith.constant 0 : index
    %c0_0 = arith.constant 0 : index
    %0 = vector.load %arg1[%c0, %c0_0] : memref<256x32xf32, #tpu.memory_space<vmem>>, vector<256x32xf32>
    %1 = arith.truncf %0 : vector<256x32xf32> to vector<256x32xbf16>
    %c0_1 = arith.constant 0 : index
    %c0_2 = arith.constant 0 : index
    %2 = vector.load %arg2[%c0_1, %c0_2] : memref<32x16xbf16, #tpu.memory_space<vmem>>, vector<32x16xbf16>
    %cst = arith.constant dense<0.000000e+00> : vector<256x16xf32>
    %3 = tpu.matmul %1, %2, %cst {dimension_numbers = #tpu.dot_dimension_numbers<[1], [0], [0], [1], [0, 0, 1, 1], [], []>} : vector<256x32xbf16>, vector<32x16xbf16>, vector<256x16xf32> -> vector<256x16xf32>
    %c0_3 = arith.constant 0 : index
    %c0_4 = arith.constant 0 : index
    %4 = vector.load %arg3[%c0_3, %c0_4] : memref<1x16xf32, #tpu.memory_space<vmem>>, vector<1x16xf32>
    %5 = vector.broadcast %4 : vector<1x16xf32> to vector<256x16xf32>
    %6 = arith.addf %3, %5 : vector<256x16xf32>
    %cst_5 = arith.constant 0.000000e+00 : f32
    %7 = vector.broadcast %cst_5 : f32 to vector<256x16xf32>
    %8 = arith.maximumf %6, %7 : vector<256x16xf32>
    %c0_6 = arith.constant 0 : index
    %c0_7 = arith.constant 0 : index
    %9 = vector.load %arg4[%c0_6, %c0_7] : memref<256x16xf32, #tpu.memory_space<vmem>>, vector<256x16xf32>
    tpu.vector_store %arg4[%c0_6, %c0_7], %8 {strides = array<i32>} : memref<256x16xf32, #tpu.memory_space<vmem>>, vector<256x16xf32>,
    return
  }
  func.func @transform_0(%arg0: i32) -> (i32, i32) {
    %c0_i32 = arith.constant 0 : i32
    %c0_i32_0 = arith.constant 0 : i32
    %c0_i32_1 = arith.constant 0 : i32
    return %c0_i32, %c0_i32_0 : i32, i32
  }
  func.func @transform_1(%arg0: i32) -> (i32, i32) {
    %c0_i32 = arith.constant 0 : i32
    %c0_i32_0 = arith.constant 0 : i32
    %c0_i32_1 = arith.constant 0 : i32
    return %c0_i32, %c0_i32_0 : i32, i32
  }
  func.func @transform_2(%arg0: i32) -> (i32, i32) {
    %c0_i32 = arith.constant 0 : i32
    %c0_i32_0 = arith.constant 0 : i32
    %c0_i32_1 = arith.constant 0 : i32
    return %c0_i32, %c0_i32_0 : i32, i32
  }
  func.func @transform_3(%arg0: i32) -> (i32, i32) {
    %c0_i32 = arith.constant 0 : i32
    %c0_i32_0 = arith.constant 0 : i32
    %c0_i32_1 = arith.constant 0 : i32
    return %c0_i32, %c0_i32_0 : i32, i32
  }
}

module attributes {stable_mosaic.version = 11 : i64} {
  func.func @_matmul_bias_relu_kernel(%arg0: i32, %arg1: memref<128x16xf32, #tpu.memory_space<vmem>>, %arg2: memref<16x8xbf16, #tpu.memory_space<vmem>>, %arg3: memref<1x8xf32, #tpu.memory_space<vmem>>, %arg4: memref<128x8xf32, #tpu.memory_space<vmem>>) attributes {dimension_semantics = [#tpu.dimension_semantics<arbitrary>], iteration_bounds = array<i64: 1>, scalar_prefetch = 0 : i64, scratch_operands = 0 : i64, tpu.core_type = #tpu.core_type<tc>, window_params = [{pipeline_mode = #tpu.pipeline_mode<synchronous>, transform_indices = @transform_0, window_bounds = array<i64: 128, 16>}, {pipeline_mode = #tpu.pipeline_mode<synchronous>, transform_indices = @transform_1, window_bounds = array<i64: 16, 8>}, {pipeline_mode = #tpu.pipeline_mode<synchronous>, transform_indices = @transform_2, window_bounds = array<i64: 1, 8>}, {pipeline_mode = #tpu.pipeline_mode<synchronous>, transform_indices = @transform_3, window_bounds = array<i64: 128, 8>}]} {
    %c0 = arith.constant 0 : index
    %c0_0 = arith.constant 0 : index
    %0 = vector.load %arg1[%c0, %c0_0] : memref<128x16xf32, #tpu.memory_space<vmem>>, vector<128x16xf32>
    %1 = arith.truncf %0 : vector<128x16xf32> to vector<128x16xbf16>
    %c0_1 = arith.constant 0 : index
    %c0_2 = arith.constant 0 : index
    %2 = vector.load %arg2[%c0_1, %c0_2] : memref<16x8xbf16, #tpu.memory_space<vmem>>, vector<16x8xbf16>
    %cst = arith.constant dense<0.000000e+00> : vector<128x8xf32>
    %3 = tpu.matmul %1, %2, %cst {dimension_numbers = #tpu.dot_dimension_numbers<[1], [0], [0], [1], [0, 0, 1, 1], [], []>} : vector<128x16xbf16>, vector<16x8xbf16>, vector<128x8xf32> -> vector<128x8xf32>
    %c0_3 = arith.constant 0 : index
    %c0_4 = arith.constant 0 : index
    %4 = vector.load %arg3[%c0_3, %c0_4] : memref<1x8xf32, #tpu.memory_space<vmem>>, vector<1x8xf32>
    %5 = vector.broadcast %4 : vector<1x8xf32> to vector<128x8xf32>
    %6 = arith.addf %3, %5 : vector<128x8xf32>
    %cst_5 = arith.constant 0.000000e+00 : f32
    %7 = vector.broadcast %cst_5 : f32 to vector<128x8xf32>
    %8 = arith.maximumf %6, %7 : vector<128x8xf32>
    %c0_6 = arith.constant 0 : index
    %c0_7 = arith.constant 0 : index
    %9 = vector.load %arg4[%c0_6, %c0_7] : memref<128x8xf32, #tpu.memory_space<vmem>>, vector<128x8xf32>
    tpu.vector_store %arg4[%c0_6, %c0_7], %8 {strides = array<i32>} : memref<128x8xf32, #tpu.memory_space<vmem>>, vector<128x8xf32>,
    return
  }
  func.func @transform_0(%arg0: i32) -> (i32, i32) {
    %c0_i32 = arith.constant 0 : i32
    %c0_i32_0 = arith.constant 0 : i32
    %c0_i32_1 = arith.constant 0 : i32
    return %c0_i32, %c0_i32_0 : i32, i32
  }
  func.func @transform_1(%arg0: i32) -> (i32, i32) {
    %c0_i32 = arith.constant 0 : i32
    %c0_i32_0 = arith.constant 0 : i32
    %c0_i32_1 = arith.constant 0 : i32
    return %c0_i32, %c0_i32_0 : i32, i32
  }
  func.func @transform_2(%arg0: i32) -> (i32, i32) {
    %c0_i32 = arith.constant 0 : i32
    %c0_i32_0 = arith.constant 0 : i32
    %c0_i32_1 = arith.constant 0 : i32
    return %c0_i32, %c0_i32_0 : i32, i32
  }
  func.func @transform_3(%arg0: i32) -> (i32, i32) {
    %c0_i32 = arith.constant 0 : i32
    %c0_i32_0 = arith.constant 0 : i32
    %c0_i32_1 = arith.constant 0 : i32
    return %c0_i32, %c0_i32_0 : i32, i32
  }
}

module attributes {stable_mosaic.version = 11 : i64} {
  func.func @_segm_head_kernel(%arg0: i32, %arg1: memref<64x16xf32, #tpu.memory_space<vmem>>, %arg2: memref<64x16xf32, #tpu.memory_space<vmem>>, %arg3: memref<64x8xf32, #tpu.memory_space<vmem>>, %arg4: memref<64x2xf32, #tpu.memory_space<vmem>>, %arg5: memref<64x1xf32, #tpu.memory_space<vmem>>, %arg6: memref<2x16xf32, #tpu.memory_space<vmem>>, %arg7: memref<8x16xf32, #tpu.memory_space<vmem>>, %arg8: memref<1x16xf32, #tpu.memory_space<vmem>>, %arg9: memref<1x16xf32, #tpu.memory_space<vmem>>, %arg10: memref<1x16xf32, #tpu.memory_space<vmem>>, %arg11: memref<1x1xf32, #tpu.memory_space<vmem>>, %arg12: memref<1x1x64xf32, #tpu.memory_space<vmem>>) attributes {dimension_semantics = [#tpu.dimension_semantics<parallel>], iteration_bounds = array<i64: 2>, scalar_prefetch = 0 : i64, scratch_operands = 0 : i64, tpu.core_type = #tpu.core_type<tc>, window_params = [{transform_indices = @transform_0, window_bounds = array<i64: 64, 16>}, {transform_indices = @transform_1, window_bounds = array<i64: 64, 16>}, {transform_indices = @transform_2, window_bounds = array<i64: 64, 8>}, {transform_indices = @transform_3, window_bounds = array<i64: 64, 2>}, {transform_indices = @transform_4, window_bounds = array<i64: 64, 1>}, {pipeline_mode = #tpu.pipeline_mode<synchronous>, transform_indices = @transform_5, window_bounds = array<i64: 2, 16>}, {pipeline_mode = #tpu.pipeline_mode<synchronous>, transform_indices = @transform_6, window_bounds = array<i64: 8, 16>}, {pipeline_mode = #tpu.pipeline_mode<synchronous>, transform_indices = @transform_7, window_bounds = array<i64: 1, 16>}, {pipeline_mode = #tpu.pipeline_mode<synchronous>, transform_indices = @transform_8, window_bounds = array<i64: 1, 16>}, {pipeline_mode = #tpu.pipeline_mode<synchronous>, transform_indices = @transform_9, window_bounds = array<i64: 1, 16>}, {pipeline_mode = #tpu.pipeline_mode<synchronous>, transform_indices = @transform_10, window_bounds = array<i64: 1, 1>}, {transform_indices = @transform_11, window_bounds = array<i64: 1, 1, 64>}]} {
    %c0 = arith.constant 0 : index
    %c0_0 = arith.constant 0 : index
    %0 = vector.load %arg1[%c0, %c0_0] : memref<64x16xf32, #tpu.memory_space<vmem>>, vector<64x16xf32>
    %c0_1 = arith.constant 0 : index
    %c0_2 = arith.constant 0 : index
    %1 = vector.load %arg2[%c0_1, %c0_2] : memref<64x16xf32, #tpu.memory_space<vmem>>, vector<64x16xf32>
    %2 = arith.mulf %0, %0 : vector<64x16xf32>
    %cst = arith.constant dense<0.000000e+00> : vector<64xf32>
    %3 = vector.multi_reduction <add>, %2, %cst [1] : vector<64x16xf32> to vector<64xf32>
    %4 = vector.shape_cast %3 : vector<64xf32> to vector<64x1xf32>
    %cst_3 = arith.constant 9.99999997E-7 : f32
    %5 = vector.broadcast %cst_3 : f32 to vector<64x1xf32>
    %6 = arith.addf %4, %5 : vector<64x1xf32>
    %7 = math.rsqrt %6 : vector<64x1xf32>
    %8 = arith.mulf %1, %1 : vector<64x16xf32>
    %cst_4 = arith.constant dense<0.000000e+00> : vector<64xf32>
    %9 = vector.multi_reduction <add>, %8, %cst_4 [1] : vector<64x16xf32> to vector<64xf32>
    %10 = vector.shape_cast %9 : vector<64xf32> to vector<64x1xf32>
    %cst_5 = arith.constant 9.99999997E-7 : f32
    %11 = vector.broadcast %cst_5 : f32 to vector<64x1xf32>
    %12 = arith.addf %10, %11 : vector<64x1xf32>
    %13 = math.rsqrt %12 : vector<64x1xf32>
    %14 = vector.broadcast %7 : vector<64x1xf32> to vector<64x16xf32>
    %15 = arith.mulf %0, %14 : vector<64x16xf32>
    %16 = arith.truncf %15 : vector<64x16xf32> to vector<64x16xbf16>
    %17 = arith.truncf %1 : vector<64x16xf32> to vector<64x16xbf16>
    %cst_6 = arith.constant dense<0.000000e+00> : vector<64x64xf32>
    %18 = tpu.matmul %16, %17, %cst_6 {dimension_numbers = #tpu.dot_dimension_numbers<[1], [1], [0], [0], [0, 0, 1, 0], [], []>} : vector<64x16xbf16>, vector<64x16xbf16>, vector<64x64xf32> -> vector<64x64xf32>
    %c0_7 = arith.constant 0 : index
    %c0_8 = arith.constant 0 : index
    %19 = vector.load %arg4[%c0_7, %c0_8] : memref<64x2xf32, #tpu.memory_space<vmem>>, vector<64x2xf32>
    %cst_9 = arith.constant dense<0.000000e+00> : vector<2xf32>
    %20 = vector.multi_reduction <add>, %19, %cst_9 [0] : vector<64x2xf32> to vector<2xf32>
    %21 = vector.shape_cast %20 : vector<2xf32> to vector<1x2xf32>
    %cst_10 = arith.constant 9.99999997E-7 : f32
    %22 = vector.broadcast %cst_10 : f32 to vector<1x2xf32>
    %23 = arith.addf %21, %22 : vector<1x2xf32>
    %24 = vector.broadcast %13 : vector<64x1xf32> to vector<64x2xf32>
    %25 = arith.mulf %19, %24 : vector<64x2xf32>
    %cst_11 = arith.constant dense<0.000000e+00> : vector<64x2xf32>
    %26 = tpu.matmul %18, %25, %cst_11 {dimension_numbers = #tpu.dot_dimension_numbers<[1], [0], [0], [1], [0, 0, 1, 1], [], []>} : vector<64x64xf32>, vector<64x2xf32>, vector<64x2xf32> -> vector<64x2xf32>
    %27 = vector.broadcast %23 : vector<1x2xf32> to vector<64x2xf32>
    %28 = arith.divf %26, %27 : vector<64x2xf32>
    %c0_12 = arith.constant 0 : index
    %c0_13 = arith.constant 0 : index
    %29 = vector.load %arg3[%c0_12, %c0_13] : memref<64x8xf32, #tpu.memory_space<vmem>>, vector<64x8xf32>
    %c0_14 = arith.constant 0 : index
    %c0_15 = arith.constant 0 : index
    %30 = vector.load %arg5[%c0_14, %c0_15] : memref<64x1xf32, #tpu.memory_space<vmem>>, vector<64x1xf32>
    %c0_16 = arith.constant 0 : index
    %c0_17 = arith.constant 0 : index
    %31 = vector.load %arg6[%c0_16, %c0_17] : memref<2x16xf32, #tpu.memory_space<vmem>>, vector<2x16xf32>
    %cst_18 = arith.constant dense<0.000000e+00> : vector<64x16xf32>
    %32 = tpu.matmul %28, %31, %cst_18 {dimension_numbers = #tpu.dot_dimension_numbers<[1], [0], [0], [1], [0, 0, 1, 1], [], []>} : vector<64x2xf32>, vector<2x16xf32>, vector<64x16xf32> -> vector<64x16xf32>
    %c0_19 = arith.constant 0 : index
    %c0_20 = arith.constant 0 : index
    %33 = vector.load %arg7[%c0_19, %c0_20] : memref<8x16xf32, #tpu.memory_space<vmem>>, vector<8x16xf32>
    %cst_21 = arith.constant dense<0.000000e+00> : vector<64x16xf32>
    %34 = tpu.matmul %29, %33, %cst_21 {dimension_numbers = #tpu.dot_dimension_numbers<[1], [0], [0], [1], [0, 0, 1, 1], [], []>} : vector<64x8xf32>, vector<8x16xf32>, vector<64x16xf32> -> vector<64x16xf32>
    %35 = arith.addf %32, %34 : vector<64x16xf32>
    %c0_22 = arith.constant 0 : index
    %c0_23 = arith.constant 0 : index
    %36 = vector.load %arg8[%c0_22, %c0_23] : memref<1x16xf32, #tpu.memory_space<vmem>>, vector<1x16xf32>
    %37 = vector.broadcast %30 : vector<64x1xf32> to vector<64x16xf32>
    %38 = vector.broadcast %36 : vector<1x16xf32> to vector<64x16xf32>
    %39 = arith.mulf %37, %38 : vector<64x16xf32>
    %40 = arith.addf %35, %39 : vector<64x16xf32>
    %c0_24 = arith.constant 0 : index
    %c0_25 = arith.constant 0 : index
    %41 = vector.load %arg9[%c0_24, %c0_25] : memref<1x16xf32, #tpu.memory_space<vmem>>, vector<1x16xf32>
    %42 = vector.broadcast %41 : vector<1x16xf32> to vector<64x16xf32>
    %43 = arith.addf %40, %42 : vector<64x16xf32>
    %cst_26 = arith.constant 0.000000e+00 : f32
    %44 = vector.broadcast %cst_26 : f32 to vector<64x16xf32>
    %45 = arith.maximumf %43, %44 : vector<64x16xf32>
    %c0_27 = arith.constant 0 : index
    %c0_28 = arith.constant 0 : index
    %46 = vector.load %arg10[%c0_27, %c0_28] : memref<1x16xf32, #tpu.memory_space<vmem>>, vector<1x16xf32>
    %cst_29 = arith.constant dense<0.000000e+00> : vector<1x64xf32>
    %47 = tpu.matmul %46, %45, %cst_29 {dimension_numbers = #tpu.dot_dimension_numbers<[1], [1], [0], [0], [0, 0, 1, 0], [], []>} : vector<1x16xf32>, vector<64x16xf32>, vector<1x64xf32> -> vector<1x64xf32>
    %c0_30 = arith.constant 0 : index
    %c0_31 = arith.constant 0 : index
    %48 = vector.load %arg11[%c0_30, %c0_31] : memref<1x1xf32, #tpu.memory_space<vmem>>, vector<1x1xf32>
    %49 = vector.broadcast %48 : vector<1x1xf32> to vector<1x64xf32>
    %50 = arith.addf %47, %49 : vector<1x64xf32>
    %c0_32 = arith.constant 0 : index
    %c0_33 = arith.constant 0 : index
    %c0_34 = arith.constant 0 : index
    %51 = vector.load %arg12[%c0_32, %c0_33, %c0_34] : memref<1x1x64xf32, #tpu.memory_space<vmem>>, vector<1x1x64xf32>
    %52 = vector.shape_cast %51 : vector<1x1x64xf32> to vector<1x64xf32>
    %53 = vector.shape_cast %50 : vector<1x64xf32> to vector<1x1x64xf32>
    tpu.vector_store %arg12[%c0_32, %c0_33, %c0_34], %53 {strides = array<i32>} : memref<1x1x64xf32, #tpu.memory_space<vmem>>, vector<1x1x64xf32>,
    return
  }
  func.func @transform_0(%arg0: i32) -> (i32, i32) {
    %c2_i32 = arith.constant 2 : i32
    %0 = arith.addi %c2_i32, %arg0 : i32
    %c0_i32 = arith.constant 0 : i32
    %c0_i32_0 = arith.constant 0 : i32
    return %0, %c0_i32 : i32, i32
  }
  func.func @transform_1(%arg0: i32) -> (i32, i32) {
    %c0_i32 = arith.constant 0 : i32
    %c0_i32_0 = arith.constant 0 : i32
    return %arg0, %c0_i32 : i32, i32
  }
  func.func @transform_2(%arg0: i32) -> (i32, i32) {
    %c0_i32 = arith.constant 0 : i32
    %c0_i32_0 = arith.constant 0 : i32
    return %arg0, %c0_i32 : i32, i32
  }
  func.func @transform_3(%arg0: i32) -> (i32, i32) {
    %c0_i32 = arith.constant 0 : i32
    %c0_i32_0 = arith.constant 0 : i32
    return %arg0, %c0_i32 : i32, i32
  }
  func.func @transform_4(%arg0: i32) -> (i32, i32) {
    %c0_i32 = arith.constant 0 : i32
    %c0_i32_0 = arith.constant 0 : i32
    return %arg0, %c0_i32 : i32, i32
  }
  func.func @transform_5(%arg0: i32) -> (i32, i32) {
    %c0_i32 = arith.constant 0 : i32
    %c0_i32_0 = arith.constant 0 : i32
    %c0_i32_1 = arith.constant 0 : i32
    return %c0_i32, %c0_i32_0 : i32, i32
  }
  func.func @transform_6(%arg0: i32) -> (i32, i32) {
    %c0_i32 = arith.constant 0 : i32
    %c0_i32_0 = arith.constant 0 : i32
    %c0_i32_1 = arith.constant 0 : i32
    return %c0_i32, %c0_i32_0 : i32, i32
  }
  func.func @transform_7(%arg0: i32) -> (i32, i32) {
    %c0_i32 = arith.constant 0 : i32
    %c0_i32_0 = arith.constant 0 : i32
    %c0_i32_1 = arith.constant 0 : i32
    return %c0_i32, %c0_i32_0 : i32, i32
  }
  func.func @transform_8(%arg0: i32) -> (i32, i32) {
    %c0_i32 = arith.constant 0 : i32
    %c0_i32_0 = arith.constant 0 : i32
    %c0_i32_1 = arith.constant 0 : i32
    return %c0_i32, %c0_i32_0 : i32, i32
  }
  func.func @transform_9(%arg0: i32) -> (i32, i32) {
    %c0_i32 = arith.constant 0 : i32
    %c0_i32_0 = arith.constant 0 : i32
    %c0_i32_1 = arith.constant 0 : i32
    return %c0_i32, %c0_i32_0 : i32, i32
  }
  func.func @transform_10(%arg0: i32) -> (i32, i32) {
    %c0_i32 = arith.constant 0 : i32
    %c0_i32_0 = arith.constant 0 : i32
    %c0_i32_1 = arith.constant 0 : i32
    return %c0_i32, %c0_i32_0 : i32, i32
  }
  func.func @transform_11(%arg0: i32) -> (i32, i32, i32) {
    %c0_i32 = arith.constant 0 : i32
    %c0_i32_0 = arith.constant 0 : i32
    %c0_i32_1 = arith.constant 0 : i32
    return %arg0, %c0_i32, %c0_i32_0 : i32, i32, i32
  }
}

</mosaic_0001>

<bundles_post_ra>
// kernel: depth_segm_net_forward.3
= control target key start
LH: loop header
LB: loop body
LE: loop exit
PB: predicated region body
PF: predicated region fallthrough
CT: control target
= control target key end

     0   :  { %vm86_vm0 = vcmask 261120   ;;  %vm328_vm1 = vcmask 130048   ;;  %s747_s1 = inlined_call_operand.vmem [shape: bf16[32,16], index: 1, kind: input, shape index: {}]   ;;  %s748_s0 = inlined_call_operand.vmem [shape: f32[256,32], index: 0, kind: input, shape index: {}]   ;;  %s749_s2 = inlined_call_operand.vmem [shape: f32[1,16], index: 2, kind: input, shape index: {}]   ;;  %s750_s3 = inlined_call_operand.vmem [shape: f32[256,16], index: 3, kind: output, shape index: {}]  }
   0x1   :  { %v442_v0 = vld [vmem:[%s747_s1] sm:$0xff]   ;;  %v443_v1 = vld [vmem:[%s747_s1 + $0x8] sm:$0xff]   ;;  %v17_v7 = vld [vmem:[%s748_s0 + $0x10] sm:$0xff] }
   0x2   :  { %402 = vmatprep.subr.bf16.mxu0 %v442_v0  ;;  %438 = vmatprep.subr.bf16.mxu1 %v442_v0  ;;  %v15_v2 = vld [vmem:[%s748_s0] sm:$0xff]  ;;  %v16_v3 = vld [vmem:[%s748_s0 + $0x8] sm:$0xff]  ;;  %v18_v8 = vld [vmem:[%s748_s0 + $0x18] sm:$0xff] }
   0x3   :  { %v31_v4 = vld [vmem:[%s748_s0 + $0x80] sm:$0xff]  ;;  %403 = vmatpush3.bf16.msra.mxu0 %v442_v0  ;;  %440 = vmatpush3.bf16.msra.mxu1 %v442_v0  ;;  %v47_v5 = vpack.c.bf16 %v16_v3, %v15_v2  ;;  %v32_v6 = vld [vmem:[%s748_s0 + $0x88] sm:$0xff]  ;;  %v33_v10 = vld [vmem:[%s748_s0 + $0x90] sm:$0xff]  ;;  %v48_v16 = vpack.c.bf16 %v18_v8, %v17_v7 }
   0x4   :  { %404 = vmatprep.subr.bf16.mxu0 %v443_v1  ;;  %439 = vmatprep.subr.bf16.mxu1 %v443_v1  ;;  %v55_v9 = vpack.c.bf16 %v32_v6, %v31_v4  ;;  %v34_v11 = vld [vmem:[%s748_s0 + $0x98] sm:$0xff]  ;;  %v19_v12 = vld [vmem:[%s748_s0 + $0x20] sm:$0xff]  ;;  %v20_v13 = vld [vmem:[%s748_s0 + $0x28] sm:$0xff] }
   0x5   :  { %406 = vmatprep.mubr.msk.bf16.mxu0 %vm86_vm0, %v47_v5  ;;  %v35_v14 = vld [vmem:[%s748_s0 + $0xa0] sm:$0xff]  ;;  %v36_v15 = vld [vmem:[%s748_s0 + $0xa8] sm:$0xff]  ;;  %v56_v17 = vpack.c.bf16 %v34_v11, %v33_v10  ;;  %v49_v18 = vpack.c.bf16 %v20_v13, %v19_v12  ;;  %v21_v20 = vld [vmem:[%s748_s0 + $0x30] sm:$0xff] }
   0x6   :  { %422 = vmatprep.mubr.msk.bf16.mxu1 %vm86_vm0, %v55_v9  ;;  %v57_v19 = vpack.c.bf16 %v36_v15, %v35_v14  ;;  %v22_v21 = vld [vmem:[%s748_s0 + $0x38] sm:$0xff]  ;;  %v37_v22 = vld [vmem:[%s748_s0 + $0xb0] sm:$0xff]  ;;  %v23_v24 = vld [vmem:[%s748_s0 + $0x40] sm:$0xff] }
   0x7   :  { %405 = vmatpush3.bf16.msra.mxu0 %v443_v1  ;;  %441 = vmatpush3.bf16.msra.mxu1 %v443_v1  ;;  %v38_v23 = vld [vmem:[%s748_s0 + $0xb8] sm:$0xff]  ;;  %v24_v25 = vld [vmem:[%s748_s0 + $0x48] sm:$0xff]  ;;  %v39_v26 = vld [vmem:[%s748_s0 + $0xc0] sm:$0xff]  ;;  %v50_v28 = vpack.c.bf16 %v22_v21, %v21_v20 }
   0x8   :  { %v40_v27 = vld [vmem:[%s748_s0 + $0xc8] sm:$0xff]  ;;  %v58_v29 = vpack.c.bf16 %v38_v23, %v37_v22  ;;  %v51_v30 = vpack.c.bf16 %v24_v25, %v23_v24  ;;  %v25_v32 = vld [vmem:[%s748_s0 + $0x50] sm:$0xff]  ;;  %v26_v33 = vld [vmem:[%s748_s0 + $0x58] sm:$0xff] }
   0x9   :  { %v59_v31 = vpack.c.bf16 %v40_v27, %v39_v26  ;;  %v41_v34 = vld [vmem:[%s748_s0 + $0xd0] sm:$0xff]  ;;  %v42_v35 = vld [vmem:[%s748_s0 + $0xd8] sm:$0xff]  ;;  %v27_v36 = vld [vmem:[%s748_s0 + $0x60] sm:$0xff]  ;;  %v52_v40 = vpack.c.bf16 %v26_v33, %v25_v32 }
   0xa   :  { %407 = vmatmul.mubr.msk.bf16.vlgmr.msra.gmra.mrb[0].mxu0 %vm86_vm0, %v48_v16  ;;  %423 = vmatmul.mubr.msk.bf16.vlgmr.msra.gmra.mrb[0].mxu1 %vm86_vm0, %v56_v17  ;;  %v28_v37 = vld [vmem:[%s748_s0 + $0x68] sm:$0xff]  ;;  %v43_v38 = vld [vmem:[%s748_s0 + $0xe0] sm:$0xff]  ;;  %v60_v41 = vpack.c.bf16 %v42_v35, %v41_v34  ;;  %v29_v44 = vld [vmem:[%s748_s0 + $0x70] sm:$0xff] }
   0xb   :  { %410 = vmatprep.mubr.msk.bf16.mxu0 %vm86_vm0, %v49_v18  ;;  %426 = vmatprep.mubr.msk.bf16.mxu1 %vm86_vm0, %v57_v19  ;;  %v44_v39 = vld [vmem:[%s748_s0 + $0xe8] sm:$0xff]  ;;  %v53_v42 = vpack.c.bf16 %v28_v37, %v27_v36  ;;  %v30_v45 = vld [vmem:[%s748_s0 + $0x78] sm:$0xff]  ;;  %v45_v46 = vld [vmem:[%s748_s0 + $0xf0] sm:$0xff] }
   0xc   :  { %v61_v43 = vpack.c.bf16 %v44_v39, %v43_v38  ;;  %v46_v47 = vld [vmem:[%s748_s0 + $0xf8] sm:$0xff]  ;;  %v54_v48 = vpack.c.bf16 %v30_v45, %v29_v44  ;;  %v585_v50 = vld [vmem:[%s749_s2] ss:$0 sm:$0xff] }
   0xd   :  { %v62_v49 = vpack.c.bf16 %v46_v47, %v45_v46 }
  0x12   :  { %411 = vmatmul.mubr.msk.bf16.gmra.mrb[4].mxu0 %vm86_vm0, %v50_v28  ;;  %427 = vmatmul.mubr.msk.bf16.gmra.mrb[4].mxu1 %vm86_vm0, %v58_v29 }
  0x13   :  { %414 = vmatprep.mubr.msk.bf16.mxu0 %vm86_vm0, %v51_v30  ;;  %430 = vmatprep.mubr.msk.bf16.mxu1 %vm86_vm0, %v59_v31 }
  0x1a   :  { %415 = vmatmul.mubr.msk.bf16.gmra.mrb[8].mxu0 %vm86_vm0, %v52_v40  ;;  %431 = vmatmul.mubr.msk.bf16.gmra.mrb[8].mxu1 %vm86_vm0, %v60_v41 }
  0x1b   :  { %418 = vmatprep.mubr.msk.bf16.mxu0 %vm86_vm0, %v53_v42  ;;  %434 = vmatprep.mubr.msk.bf16.mxu1 %vm86_vm0, %v61_v43 }
  0x22   :  { %419 = vmatmul.mubr.msk.bf16.gmra.mrb[12].mxu0 %vm86_vm0, %v54_v48  ;;  %435 = vmatmul.mubr.msk.bf16.gmra.mrb[12].mxu1 %vm86_vm0, %v62_v49 }
  0xdd   :  { %v408_v51 = vpop.f32.mrb[0].mxu0  ;;  %v424_v52 = vpop.f32.mrb[0].mxu1 }
  0xde   :  { %v178_v53 = vadd.f32 %v408_v51, %v585_v50  ;;  %v242_v54 = vadd.f32 %v424_v52, %v585_v50  ;;  %v169_v55 = vpop.f32.mrb[1].mxu0  ;;  %v233_v56 = vpop.f32.mrb[1].mxu1 }
  0xdf   :  { %v170_v57 = vadd.f32 %v585_v50, %v169_v55  ;;  %v234_v58 = vadd.f32 %v585_v50, %v233_v56  ;;  %v409_v59 = vpop.f32.mrb[2].mxu0  ;;  %v425_v60 = vpop.f32.mrb[2].mxu1 }
  0xe0   :  { %v298_v61 = vmax.f32 %v178_v53, 0.0  ;;  %v314_v62 = vmax.f32 %v242_v54, 0.0  ;;  %v181_v63 = vadd.f32 %v409_v59, %v585_v50  ;;  %v245_v0 = vadd.f32 %v425_v60, %v585_v50  ;;  %v172_v1 = vpop.f32.mrb[3].mxu0  ;;  %v236_v2 = vpop.f32.mrb[3].mxu1 }
  0xe1   :  { %v296_v3 = vmax.f32 %v170_v57, 0.0  ;;  %v312_v4 = vmax.f32 %v234_v58, 0.0  ;;  %v173_v5 = vadd.f32 %v585_v50, %v172_v1  ;;  %v237_v6 = vadd.f32 %v585_v50, %v236_v2 }
  0xe2   :  { %331 = vst.msk [vmem:[%s750_s3 + $0x10] sm:$0xff] %vm328_vm1, %v298_v61  ;;  %347 = vst.msk [vmem:[%s750_s3 + $0x90] sm:$0xff] %vm328_vm1, %v314_v62  ;;  %v299_v7 = vmax.f32 %v181_v63, 0.0  ;;  %v315_v8 = vmax.f32 %v245_v0, 0.0 }
  0xe3   :  { %329 = vst.msk [vmem:[%s750_s3] sm:$0xff] %vm328_vm1, %v296_v3  ;;  %345 = vst.msk [vmem:[%s750_s3 + $0x80] sm:$0xff] %vm328_vm1, %v312_v4  ;;  %v297_v9 = vmax.f32 %v173_v5, 0.0  ;;  %v313_v10 = vmax.f32 %v237_v6, 0.0 }
  0xe4   :  { %332 = vst.msk [vmem:[%s750_s3 + $0x18] sm:$0xff] %vm328_vm1, %v299_v7  ;;  %348 = vst.msk [vmem:[%s750_s3 + $0x98] sm:$0xff] %vm328_vm1, %v315_v8 }
  0xe5   :  { %330 = vst.msk [vmem:[%s750_s3 + $0x8] sm:$0xff] %vm328_vm1, %v297_v9  ;;  %346 = vst.msk [vmem:[%s750_s3 + $0x88] sm:$0xff] %vm328_vm1, %v313_v10  ;;  %v412_v11 = vpop.f32.mrb[4].mxu0  ;;  %v428_v12 = vpop.f32.mrb[4].mxu1 }
  0xe6   :  { %v194_v13 = vadd.f32 %v412_v11, %v585_v50  ;;  %v258_v14 = vadd.f32 %v428_v12, %v585_v50  ;;  %v185_v15 = vpop.f32.mrb[5].mxu0  ;;  %v249_v16 = vpop.f32.mrb[5].mxu1 }
  0xe7   :  { %v186_v17 = vadd.f32 %v585_v50, %v185_v15  ;;  %v250_v18 = vadd.f32 %v585_v50, %v249_v16  ;;  %v413_v19 = vpop.f32.mrb[6].mxu0  ;;  %v429_v20 = vpop.f32.mrb[6].mxu1 }
  0xe8   :  { %v302_v21 = vmax.f32 %v194_v13, 0.0  ;;  %v318_v22 = vmax.f32 %v258_v14, 0.0  ;;  %v197_v23 = vadd.f32 %v413_v19, %v585_v50  ;;  %v261_v24 = vadd.f32 %v429_v20, %v585_v50  ;;  %v188_v25 = vpop.f32.mrb[7].mxu0  ;;  %v252_v26 = vpop.f32.mrb[7].mxu1 }
  0xe9   :  { %v300_v27 = vmax.f32 %v186_v17, 0.0  ;;  %v316_v28 = vmax.f32 %v250_v18, 0.0  ;;  %v189_v29 = vadd.f32 %v585_v50, %v188_v25  ;;  %v253_v30 = vadd.f32 %v585_v50, %v252_v26 }
  0xea   :  { %335 = vst.msk [vmem:[%s750_s3 + $0x30] sm:$0xff] %vm328_vm1, %v302_v21  ;;  %351 = vst.msk [vmem:[%s750_s3 + $0xb0] sm:$0xff] %vm328_vm1, %v318_v22  ;;  %v303_v31 = vmax.f32 %v197_v23, 0.0  ;;  %v319_v32 = vmax.f32 %v261_v24, 0.0 }
  0xeb   :  { %333 = vst.msk [vmem:[%s750_s3 + $0x20] sm:$0xff] %vm328_vm1, %v300_v27  ;;  %349 = vst.msk [vmem:[%s750_s3 + $0xa0] sm:$0xff] %vm328_vm1, %v316_v28  ;;  %v301_v33 = vmax.f32 %v189_v29, 0.0  ;;  %v317_v34 = vmax.f32 %v253_v30, 0.0 }
  0xec   :  { %336 = vst.msk [vmem:[%s750_s3 + $0x38] sm:$0xff] %vm328_vm1, %v303_v31  ;;  %352 = vst.msk [vmem:[%s750_s3 + $0xb8] sm:$0xff] %vm328_vm1, %v319_v32 }
  0xed   :  { %334 = vst.msk [vmem:[%s750_s3 + $0x28] sm:$0xff] %vm328_vm1, %v301_v33  ;;  %350 = vst.msk [vmem:[%s750_s3 + $0xa8] sm:$0xff] %vm328_vm1, %v317_v34  ;;  %v416_v35 = vpop.f32.mrb[8].mxu0  ;;  %v432_v36 = vpop.f32.mrb[8].mxu1 }
  0xee   :  { %v210_v37 = vadd.f32 %v416_v35, %v585_v50  ;;  %v274_v38 = vadd.f32 %v432_v36, %v585_v50  ;;  %v201_v39 = vpop.f32.mrb[9].mxu0  ;;  %v265_v40 = vpop.f32.mrb[9].mxu1 }
  0xef   :  { %v202_v41 = vadd.f32 %v585_v50, %v201_v39  ;;  %v266_v42 = vadd.f32 %v585_v50, %v265_v40  ;;  %v417_v43 = vpop.f32.mrb[10].mxu0  ;;  %v433_v44 = vpop.f32.mrb[10].mxu1 }
  0xf0   :  { %v306_v45 = vmax.f32 %v210_v37, 0.0  ;;  %v322_v46 = vmax.f32 %v274_v38, 0.0  ;;  %v213_v47 = vadd.f32 %v417_v43, %v585_v50  ;;  %v277_v48 = vadd.f32 %v433_v44, %v585_v50  ;;  %v204_v49 = vpop.f32.mrb[11].mxu0  ;;  %v268_v51 = vpop.f32.mrb[11].mxu1 }
  0xf1   :  { %v304_v52 = vmax.f32 %v202_v41, 0.0  ;;  %v320_v53 = vmax.f32 %v266_v42, 0.0  ;;  %v205_v54 = vadd.f32 %v585_v50, %v204_v49  ;;  %v269_v55 = vadd.f32 %v585_v50, %v268_v51 }
  0xf2   :  { %339 = vst.msk [vmem:[%s750_s3 + $0x50] sm:$0xff] %vm328_vm1, %v306_v45  ;;  %355 = vst.msk [vmem:[%s750_s3 + $0xd0] sm:$0xff] %vm328_vm1, %v322_v46  ;;  %v307_v56 = vmax.f32 %v213_v47, 0.0  ;;  %v323_v57 = vmax.f32 %v277_v48, 0.0 }
  0xf3   :  { %337 = vst.msk [vmem:[%s750_s3 + $0x40] sm:$0xff] %vm328_vm1, %v304_v52  ;;  %353 = vst.msk [vmem:[%s750_s3 + $0xc0] sm:$0xff] %vm328_vm1, %v320_v53  ;;  %v305_v58 = vmax.f32 %v205_v54, 0.0  ;;  %v321_v59 = vmax.f32 %v269_v55, 0.0 }
  0xf4   :  { %340 = vst.msk [vmem:[%s750_s3 + $0x58] sm:$0xff] %vm328_vm1, %v307_v56  ;;  %356 = vst.msk [vmem:[%s750_s3 + $0xd8] sm:$0xff] %vm328_vm1, %v323_v57 }
  0xf5   :  { %338 = vst.msk [vmem:[%s750_s3 + $0x48] sm:$0xff] %vm328_vm1, %v305_v58  ;;  %354 = vst.msk [vmem:[%s750_s3 + $0xc8] sm:$0xff] %vm328_vm1, %v321_v59  ;;  %v420_v60 = vpop.f32.mrb[12].mxu0  ;;  %v436_v61 = vpop.f32.mrb[12].mxu1 }
  0xf6   :  { %v226_v62 = vadd.f32 %v420_v60, %v585_v50  ;;  %v290_v63 = vadd.f32 %v436_v61, %v585_v50  ;;  %v217_v0 = vpop.f32.mrb[13].mxu0  ;;  %v281_v1 = vpop.f32.mrb[13].mxu1 }
  0xf7   :  { %v218_v2 = vadd.f32 %v585_v50, %v217_v0  ;;  %v282_v3 = vadd.f32 %v585_v50, %v281_v1  ;;  %v421_v4 = vpop.f32.mrb[14].mxu0  ;;  %v437_v5 = vpop.f32.mrb[14].mxu1 }
  0xf8   :  { %v310_v6 = vmax.f32 %v226_v62, 0.0  ;;  %v326_v7 = vmax.f32 %v290_v63, 0.0  ;;  %v229_v8 = vadd.f32 %v421_v4, %v585_v50  ;;  %v293_v9 = vadd.f32 %v437_v5, %v585_v50  ;;  %v220_v10 = vpop.f32.mrb[15].mxu0  ;;  %v284_v11 = vpop.f32.mrb[15].mxu1 }
  0xf9   :  { %v308_v12 = vmax.f32 %v218_v2, 0.0  ;;  %v324_v13 = vmax.f32 %v282_v3, 0.0  ;;  %v221_v14 = vadd.f32 %v585_v50, %v220_v10  ;;  %v285_v15 = vadd.f32 %v585_v50, %v284_v11 }
  0xfa   :  { %343 = vst.msk [vmem:[%s750_s3 + $0x70] sm:$0xff] %vm328_vm1, %v310_v6  ;;  %359 = vst.msk [vmem:[%s750_s3 + $0xf0] sm:$0xff] %vm328_vm1, %v326_v7  ;;  %v311_v16 = vmax.f32 %v229_v8, 0.0  ;;  %v327_v17 = vmax.f32 %v293_v9, 0.0 }
  0xfb   :  { %341 = vst.msk [vmem:[%s750_s3 + $0x60] sm:$0xff] %vm328_vm1, %v308_v12  ;;  %357 = vst.msk [vmem:[%s750_s3 + $0xe0] sm:$0xff] %vm328_vm1, %v324_v13  ;;  %v309_v50 = vmax.f32 %v221_v14, 0.0  ;;  %v325_v18 = vmax.f32 %v285_v15, 0.0 }
  0xfc   :  { %344 = vst.msk [vmem:[%s750_s3 + $0x78] sm:$0xff] %vm328_vm1, %v311_v16  ;;  %360 = vst.msk [vmem:[%s750_s3 + $0xf8] sm:$0xff] %vm328_vm1, %v327_v17 }
  0xfd   :  { %342 = vst.msk [vmem:[%s750_s3 + $0x68] sm:$0xff] %vm328_vm1, %v309_v50  ;;  %358 = vst.msk [vmem:[%s750_s3 + $0xe8] sm:$0xff] %vm328_vm1, %v325_v18 }

// kernel: depth_segm_net_forward.4
= control target key start
LH: loop header
LB: loop body
LE: loop exit
PB: predicated region body
PF: predicated region fallthrough
CT: control target
= control target key end

     0   :  { %vm54_vm0 = vcmask 130048   ;;  %vm192_vm1 = vcmask 64512   ;;  %s399_s1 = inlined_call_operand.vmem [shape: bf16[16,8], index: 1, kind: input, shape index: {}]   ;;  %s400_s0 = inlined_call_operand.vmem [shape: f32[128,16], index: 0, kind: input, shape index: {}]   ;;  %s401_s2 = inlined_call_operand.vmem [shape: f32[1,8], index: 2, kind: input, shape index: {}]   ;;  %s402_s3 = inlined_call_operand.vmem [shape: f32[128,8], index: 3, kind: output, shape index: {}]  }
   0x1   :  { %v252_v0 = vld [vmem:[%s399_s1] sm:$0xff]   ;;  %v16_v2 = vld [vmem:[%s400_s0 + $0x8] sm:$0xff]  ;;  %v17_v6 = vld [vmem:[%s400_s0 + $0x10] sm:$0xff] }
   0x2   :  { %v15_v1 = vld [vmem:[%s400_s0] sm:$0xff]  ;;  %232 = vmatprep.subr.bf16.mxu0 %v252_v0  ;;  %250 = vmatprep.subr.bf16.mxu1 %v252_v0  ;;  %v24_v5 = vld [vmem:[%s400_s0 + $0x48] sm:$0xff]  ;;  %v18_v7 = vld [vmem:[%s400_s0 + $0x18] sm:$0xff] }
   0x3   :  { %v23_v3 = vld [vmem:[%s400_s0 + $0x40] sm:$0xff]  ;;  %v31_v4 = vpack.c.bf16 %v16_v2, %v15_v1  ;;  %233 = vmatpush3.bf16.msra.mxu0 %v252_v0  ;;  %251 = vmatpush3.bf16.msra.mxu1 %v252_v0  ;;  %v32_v9 = vpack.c.bf16 %v18_v7, %v17_v6  ;;  %v25_v10 = vld [vmem:[%s400_s0 + $0x50] sm:$0xff]  ;;  %v26_v11 = vld [vmem:[%s400_s0 + $0x58] sm:$0xff] }
   0x4   :  { %v35_v8 = vpack.c.bf16 %v24_v5, %v23_v3  ;;  %v19_v12 = vld [vmem:[%s400_s0 + $0x20] sm:$0xff]  ;;  %v36_v13 = vpack.c.bf16 %v26_v11, %v25_v10  ;;  %v20_v14 = vld [vmem:[%s400_s0 + $0x28] sm:$0xff]  ;;  %v21_v19 = vld [vmem:[%s400_s0 + $0x30] sm:$0xff] }
   0x5   :  { %234 = vmatprep.mubr.msk.bf16.mxu0 %vm54_vm0, %v31_v4  ;;  %v27_v15 = vld [vmem:[%s400_s0 + $0x60] sm:$0xff]  ;;  %v28_v16 = vld [vmem:[%s400_s0 + $0x68] sm:$0xff]  ;;  %v33_v17 = vpack.c.bf16 %v20_v14, %v19_v12  ;;  %v22_v20 = vld [vmem:[%s400_s0 + $0x38] sm:$0xff] }
   0x6   :  { %242 = vmatprep.mubr.msk.bf16.mxu1 %vm54_vm0, %v35_v8  ;;  %v37_v18 = vpack.c.bf16 %v28_v16, %v27_v15  ;;  %235 = vmatmul.mubr.msk.bf16.vlgmr.msra.gmra.mrb[0].mxu0 %vm54_vm0, %v32_v9  ;;  %v29_v21 = vld [vmem:[%s400_s0 + $0x70] sm:$0xff]  ;;  %v30_v22 = vld [vmem:[%s400_s0 + $0x78] sm:$0xff]  ;;  %v34_v23 = vpack.c.bf16 %v22_v20, %v21_v19  ;;  %v213_v25 = vld [vmem:[%s401_s2] ss:$0 sm:$0xff] }
   0x7   :  { %243 = vmatmul.mubr.msk.bf16.vlgmr.msra.gmra.mrb[0].mxu1 %vm54_vm0, %v36_v13  ;;  %238 = vmatprep.mubr.msk.bf16.mxu0 %vm54_vm0, %v33_v17  ;;  %v38_v24 = vpack.c.bf16 %v30_v22, %v29_v21 }
   0x8   :  { %246 = vmatprep.mubr.msk.bf16.mxu1 %vm54_vm0, %v37_v18 }
   0xe   :  { %239 = vmatmul.mubr.msk.bf16.gmra.mrb[4].mxu0 %vm54_vm0, %v34_v23 }
   0xf   :  { %247 = vmatmul.mubr.msk.bf16.gmra.mrb[4].mxu1 %vm54_vm0, %v38_v24 }
  0xd9   :  { %v236_v26 = vpop.f32.mrb[0].mxu0 }
  0xda   :  { %v244_v27 = vpop.f32.mrb[0].mxu1  ;;  %v122_v28 = vadd.f32 %v236_v26, %v213_v25  ;;  %v113_v30 = vpop.f32.mrb[1].mxu0 }
  0xdb   :  { %v154_v29 = vadd.f32 %v244_v27, %v213_v25  ;;  %v145_v31 = vpop.f32.mrb[1].mxu1  ;;  %v114_v32 = vadd.f32 %v213_v25, %v113_v30  ;;  %v237_v34 = vpop.f32.mrb[2].mxu0 }
  0xdc   :  { %v146_v33 = vadd.f32 %v213_v25, %v145_v31  ;;  %v245_v35 = vpop.f32.mrb[2].mxu1  ;;  %v178_v36 = vmax.f32 %v122_v28, 0.0  ;;  %v125_v38 = vadd.f32 %v237_v34, %v213_v25  ;;  %v116_v40 = vpop.f32.mrb[3].mxu0 }
  0xdd   :  { %v186_v37 = vmax.f32 %v154_v29, 0.0  ;;  %v157_v39 = vadd.f32 %v245_v35, %v213_v25  ;;  %v148_v41 = vpop.f32.mrb[3].mxu1  ;;  %v176_v42 = vmax.f32 %v114_v32, 0.0  ;;  %v117_v44 = vadd.f32 %v213_v25, %v116_v40 }
  0xde   :  { %v184_v43 = vmax.f32 %v146_v33, 0.0  ;;  %v149_v45 = vadd.f32 %v213_v25, %v148_v41  ;;  %195 = vst.msk [vmem:[%s402_s3 + $0x10] sm:$0xff] %vm192_vm1, %v178_v36  ;;  %v179_v46 = vmax.f32 %v125_v38, 0.0 }
  0xdf   :  { %203 = vst.msk [vmem:[%s402_s3 + $0x50] sm:$0xff] %vm192_vm1, %v186_v37  ;;  %v187_v47 = vmax.f32 %v157_v39, 0.0  ;;  %193 = vst.msk [vmem:[%s402_s3] sm:$0xff] %vm192_vm1, %v176_v42  ;;  %v177_v48 = vmax.f32 %v117_v44, 0.0 }
  0xe0   :  { %201 = vst.msk [vmem:[%s402_s3 + $0x40] sm:$0xff] %vm192_vm1, %v184_v43  ;;  %v185_v49 = vmax.f32 %v149_v45, 0.0  ;;  %196 = vst.msk [vmem:[%s402_s3 + $0x18] sm:$0xff] %vm192_vm1, %v179_v46 }
  0xe1   :  { %204 = vst.msk [vmem:[%s402_s3 + $0x58] sm:$0xff] %vm192_vm1, %v187_v47  ;;  %194 = vst.msk [vmem:[%s402_s3 + $0x8] sm:$0xff] %vm192_vm1, %v177_v48  ;;  %v240_v50 = vpop.f32.mrb[4].mxu0 }
  0xe2   :  { %202 = vst.msk [vmem:[%s402_s3 + $0x48] sm:$0xff] %vm192_vm1, %v185_v49  ;;  %v248_v51 = vpop.f32.mrb[4].mxu1  ;;  %v138_v52 = vadd.f32 %v240_v50, %v213_v25  ;;  %v129_v54 = vpop.f32.mrb[5].mxu0 }
  0xe3   :  { %v170_v53 = vadd.f32 %v248_v51, %v213_v25  ;;  %v161_v55 = vpop.f32.mrb[5].mxu1  ;;  %v130_v56 = vadd.f32 %v213_v25, %v129_v54  ;;  %v241_v58 = vpop.f32.mrb[6].mxu0 }
  0xe4   :  { %v162_v57 = vadd.f32 %v213_v25, %v161_v55  ;;  %v249_v59 = vpop.f32.mrb[6].mxu1  ;;  %v182_v60 = vmax.f32 %v138_v52, 0.0  ;;  %v141_v62 = vadd.f32 %v241_v58, %v213_v25  ;;  %v132_v0 = vpop.f32.mrb[7].mxu0 }
  0xe5   :  { %v190_v61 = vmax.f32 %v170_v53, 0.0  ;;  %v173_v63 = vadd.f32 %v249_v59, %v213_v25  ;;  %v164_v1 = vpop.f32.mrb[7].mxu1  ;;  %v180_v2 = vmax.f32 %v130_v56, 0.0  ;;  %v133_v4 = vadd.f32 %v213_v25, %v132_v0 }
  0xe6   :  { %v188_v3 = vmax.f32 %v162_v57, 0.0  ;;  %v165_v5 = vadd.f32 %v213_v25, %v164_v1  ;;  %199 = vst.msk [vmem:[%s402_s3 + $0x30] sm:$0xff] %vm192_vm1, %v182_v60  ;;  %v183_v6 = vmax.f32 %v141_v62, 0.0 }
  0xe7   :  { %207 = vst.msk [vmem:[%s402_s3 + $0x70] sm:$0xff] %vm192_vm1, %v190_v61  ;;  %v191_v7 = vmax.f32 %v173_v63, 0.0  ;;  %197 = vst.msk [vmem:[%s402_s3 + $0x20] sm:$0xff] %vm192_vm1, %v180_v2  ;;  %v181_v8 = vmax.f32 %v133_v4, 0.0 }
  0xe8   :  { %205 = vst.msk [vmem:[%s402_s3 + $0x60] sm:$0xff] %vm192_vm1, %v188_v3  ;;  %v189_v9 = vmax.f32 %v165_v5, 0.0  ;;  %200 = vst.msk [vmem:[%s402_s3 + $0x38] sm:$0xff] %vm192_vm1, %v183_v6 }
  0xe9   :  { %208 = vst.msk [vmem:[%s402_s3 + $0x78] sm:$0xff] %vm192_vm1, %v191_v7  ;;  %198 = vst.msk [vmem:[%s402_s3 + $0x28] sm:$0xff] %vm192_vm1, %v181_v8 }
  0xea   :  { %206 = vst.msk [vmem:[%s402_s3 + $0x68] sm:$0xff] %vm192_vm1, %v189_v9 }

// kernel: depth_segm_net_forward.5
= control target key start
LH: loop header
LB: loop body
LE: loop exit
PB: predicated region body
PF: predicated region fallthrough
CT: control target
= control target key end

     0   :  { %s1819_s19 = smov 0   ;;  %s2053_s0 = inlined_call_operand.vmem [shape: f32[256,16], index: 0, kind: input, shape index: {}, may-alias: {0,1}]   ;;  %s2054_s1 = inlined_call_operand.vmem [shape: f32[256,16], index: 1, kind: input, shape index: {}, may-alias: {0,1}]   ;;  %s2055_s2 = inlined_call_operand.vmem [shape: f32[128,8], index: 2, kind: input, shape index: {}]   ;;  %s2056_s3 = inlined_call_operand.vmem [shape: f32[128,2], index: 3, kind: input, shape index: {}]   ;;  %s2057_s4 = inlined_call_operand.vmem [shape: f32[128,1], index: 4, kind: input, shape index: {}]   ;;  %s2058_s5 = inlined_call_operand.vmem [shape: f32[2,16], index: 5, kind: input, shape index: {}]   ;;  %s2059_s6 = inlined_call_operand.vmem [shape: f32[8,16], index: 6, kind: input, shape index: {}]   ;;  %s2060_s7 = inlined_call_operand.vmem [shape: f32[1,16], index: 7, kind: input, shape index: {}]   ;;  %s2061_s8 = inlined_call_operand.vmem [shape: f32[1,16], index: 8, kind: input, shape index: {}]   ;;  %s2062_s9 = inlined_call_operand.vmem [shape: f32[1,16], index: 9, kind: input, shape index: {}]   ;;  %s2063_s10 = inlined_call_operand.<no memory space> [shape: f32[1,1], index: 10, kind: input, shape index: {}]   ;;  %s2064_s11 = inlined_call_operand.vmem [shape: f32[2,1,64], index: 11, kind: output, shape index: {}]  }
   0x1   :  { %v16_v0 = vstv %s2063_s10 }
   0x2   :  { %17 = vst [vmem:[#allocation2] sm:$0x1] %v16_v0 }
   0x3 LB: > { %s1825_s20 = sadd.s32 4294967295, %s1750_s19   ;;  %p1455_p0 = scmp.ge.s32.totalorder %s1750_s19, 1  ;;  %s1750_s19 = sphi %s1819_s19, %s23_s19  }
   0x4   : > { %p388_p1 = scmp.lt.s32.totalorder %s1750_s19, 3 }
   0x6   : > { %p389_p2 = pnand %p1455_p0, %p388_p1 }
   0x7   : > { %s1830_s21 = sshll.u32 (!%p389_p2), %s1825_s20, 3  ;;  %vm507_vm0 = vcmask (!%p389_p2), 130048   ;;  %vm740_vm1 = vcmask (!%p389_p2), 523264   ;;  %vm1051_vm2 = vcmask (!%p389_p2), 1041408   ;;  %vm897_vm3 = vcmask (!%p389_p2), 64512   ;;  %p479_p6 = scmp.lt.s32.totalorder (!%p389_p2), %s1825_s20, 1 }
   0x8   : > { %392 = sbr.rel (%p389_p2) target bundleno = 1086 (0x43e), region = 64  ;;  %s1509_s10 = sadd.s32 (!%p389_p2), 16, %s1830_s21  ;;  %vm709_vm4 = vcmask (!%p389_p2), 15360   ;;  %vm1754_vm5 = vmmov (!%p389_p2), 0   ;;  %vm2026_vm6 = vmpackc.low (!%p389_p2), %vm507_vm0, %vm507_vm0  ;;  %vm1354_vm7 = vcmask (!%p389_p2), 516096  }
   0x9   : > { %p456_p3 = scmp.lt.s32.totalorder (!%p389_p2), %s1830_s21, 31  ;;  %p449_p4 = scmp.lt.s32.totalorder (!%p389_p2), %s1509_s10, 31 }
   0xa   : > { %p462_p5 = scmp.lt.s32.totalorder (!%p389_p2), %s1830_s21, 15 }
   0xf   : > { %s457_s22 = scalar_select %p456_p3, %s1830_s21, 31 }
  0x10   : > { %s2068_s10 = smov (!%p449_p4, %s1509_s10), 31  ;;  %s2070_s21 = smov (!%p462_p5, %s1830_s21), 15 }
  0x11   : > { %s1459_s23 = sshll.u32 %s457_s22, 3  ;;  %s1457_s24 = sshll.u32 %s2068_s10, 3 }
  0x12   : > { %s1838_s27 = scalar_lea.vmem %s2054_s1, %s1459_s23  ;;  %s452_s30 = scalar_lea.vmem %s2053_s0, %s1457_s24 }
  0x13   : > { %v491_v1 = vld [vmem:[%s1838_s27] sm:$0xff]  ;;  %v492_v2 = vld [vmem:[%s1838_s27 + $0x8] sm:$0xff]  ;;  %v1845_v3 = vld [vmem:[%s452_s30 + $0x10] sm:$0xff]  ;;  %s1921_s12 = sshll.u32 %s2070_s21, 3  ;;  %s2072_s20 = smov (!%p479_p6, %s1825_s20), 1 }
  0x14   : > { %v1847_v4 = vld [vmem:[%s452_s30] sm:$0xff]  ;;  %v1849_v5 = vld [vmem:[%s452_s30 + $0x18] sm:$0xff]  ;;  %v608_v6 = vpack.c.bf16 %v492_v2, %v491_v1  ;;  %v501_v7 = vmul.f32 %v1845_v3, %v1845_v3  ;;  %v1857_v10 = vld [vmem:[%s452_s30 + $0x8] sm:$0xff]  ;;  %v549_v41 = vmul.f32 %v492_v2, %v492_v2  ;;  %v548_v42 = vmul.f32 %v491_v1, %v491_v1  ;;  %s1927_s15 = scalar_lea.vmem %s2056_s3, %s1921_s12  ;;  %s465_s23 = scalar_lea.vmem %s2055_s2, %s1921_s12 }
  0x15   : > { %v499_v8 = vmul.f32 %v1847_v4, %v1847_v4  ;;  %v502_v9 = vmul.f32 %v1849_v5, %v1849_v5  ;;  %v1859_v11 = vld [vmem:[%s452_s30 + $0x28] sm:$0xff]  ;;  %v500_v12 = vmul.f32 %v1857_v10, %v1857_v10  ;;  %v1863_v13 = vld [vmem:[%s452_s30 + $0x20] sm:$0xff]  ;;  %v493_v15 = vld [vmem:[%s1838_s27 + $0x10] sm:$0xff]  ;;  %s477_s26 = scalar_lea.vmem %s2057_s4, %s1921_s12  ;;  %s481_s16 = scalar_lea.vmem %s2064_s11, %s2072_s20 }
  0x16   : > { %1692 = vmatprep.subr.msk.bf16.mxu0 %vm507_vm0, %v608_v6  ;;  %v625_v14 = vsel %vm507_vm0, %v608_v6, 0  ;;  %v494_v16 = vld [vmem:[%s1838_s27 + $0x18] sm:$0xff]  ;;  %v514_v17 = vsel %vm507_vm0, %v501_v7, 0.0  ;;  %v504_v19 = vmul.f32 %v1859_v11, %v1859_v11  ;;  %v503_v22 = vmul.f32 %v1863_v13, %v1863_v13  ;;  %v1879_v25 = vld [vmem:[%s452_s30 + $0x30] sm:$0xff]  ;;  %v495_v33 = vld [vmem:[%s1838_s27 + $0x20] sm:$0xff] }
  0x17   : > { %v508_v18 = vsel %vm507_vm0, %v499_v8, 0.0  ;;  %1562 = vmatpush3.bf16.xpose.msra.mxu0 %v625_v14  ;;  %515 = vadd.xlane.f32.xlu1 %v514_v17  ;;  %v517_v20 = vsel %vm507_vm0, %v502_v9, 0.0  ;;  %v511_v21 = vsel %vm507_vm0, %v500_v12, 0.0  ;;  %v609_v23 = vpack.c.bf16 %v494_v16, %v493_v15  ;;  %v1877_v24 = vld [vmem:[%s452_s30 + $0x38] sm:$0xff]  ;;  %v496_v34 = vld [vmem:[%s1838_s27 + $0x28] sm:$0xff]  ;;  %v497_v37 = vld [vmem:[%s1838_s27 + $0x30] sm:$0xff] }
  0x18   : > { %509 = vadd.xlane.f32.xlu0 %v508_v18  ;;  %v523_v27 = vsel %vm507_vm0, %v504_v19, 0.0  ;;  %v520_v28 = vsel %vm507_vm0, %v503_v22, 0.0  ;;  %v506_v29 = vmul.f32 %v1877_v24, %v1877_v24  ;;  %v505_v30 = vmul.f32 %v1879_v25, %v1879_v25  ;;  %v498_v38 = vld [vmem:[%s1838_s27 + $0x38] sm:$0xff] }
  0x19   : > { %1693 = vmatprep.subr.msk.bf16.mxu0 %vm507_vm0, %v609_v23  ;;  %v628_v26 = vsel %vm507_vm0, %v609_v23, 0  ;;  %v610_v35 = vpack.c.bf16 %v496_v34, %v495_v33  ;;  %v611_v39 = vpack.c.bf16 %v498_v38, %v497_v37  ;;  %v551_v43 = vmul.f32 %v494_v16, %v494_v16 }
  0x1a   : > { %v529_v31 = vsel %vm507_vm0, %v506_v29, 0.0  ;;  %v526_v32 = vsel %vm507_vm0, %v505_v30, 0.0  ;;  %v550_v44 = vmul.f32 %v493_v15, %v493_v15  ;;  %v559_v45 = vsel %vm507_vm0, %v549_v41, 0.0  ;;  %v1930_v41 = vld [vmem:[%s1927_s15 + $0x8] sm:$0xff] }
  0x1b   : > { %518 = vadd.xlane.f32.xlu1 %v517_v20  ;;  %v631_v36 = vsel %vm507_vm0, %v610_v35, 0  ;;  %v634_v40 = vsel %vm507_vm0, %v611_v39, 0  ;;  %v556_v46 = vsel %vm507_vm0, %v548_v42, 0.0  ;;  %v565_v47 = vsel %vm507_vm0, %v551_v43, 0.0 }
  0x1c   : > { %512 = vadd.xlane.f32.xlu0 %v511_v21  ;;  %v562_v48 = vsel %vm507_vm0, %v550_v44, 0.0  ;;  %v553_v49 = vmul.f32 %v496_v34, %v496_v34  ;;  %v552_v50 = vmul.f32 %v495_v33, %v495_v33  ;;  %v555_v53 = vmul.f32 %v498_v38, %v498_v38  ;;  %v1933_v44 = vld [vmem:[%s1927_s15] sm:$0xff] }
  0x1d   : > { %v554_v54 = vmul.f32 %v497_v37, %v497_v37 }
  0x1e   : > { %v571_v51 = vsel %vm507_vm0, %v553_v49, 0.0  ;;  %v568_v52 = vsel %vm507_vm0, %v552_v50, 0.0  ;;  %v577_v55 = vsel %vm507_vm0, %v555_v53, 0.0 }
  0x1f   : > { %1564 = vmatpush3.bf16.xpose.msra.mxu0 %v628_v26  ;;  %524 = vadd.xlane.f32.xlu1 %v523_v27  ;;  %v574_v56 = vsel %vm507_vm0, %v554_v54, 0.0 }
  0x20   : > { %521 = vadd.xlane.f32.xlu0 %v520_v28  ;;  %1694 = vmatprep.subr.msk.bf16.mxu0 %vm507_vm0, %v610_v35 }
  0x23   : > { %530 = vadd.xlane.f32.xlu1 %v529_v31 }
  0x24   : > { %527 = vadd.xlane.f32.xlu0 %v526_v32 }
  0x27   : > { %1566 = vmatpush3.bf16.xpose.msra.mxu0 %v631_v36  ;;  %560 = vadd.xlane.f32.xlu1 %v559_v45 }
  0x28   : > { %1695 = vmatprep.subr.msk.bf16.mxu0 %vm507_vm0, %v611_v39  ;;  %557 = vadd.xlane.f32.xlu0 %v556_v46 }
  0x2b   : > { %566 = vadd.xlane.f32.xlu1 %v565_v47 }
  0x2c   : > { %563 = vadd.xlane.f32.xlu0 %v562_v48 }
  0x2f   : > { %1568 = vmatpush3.bf16.xpose.msra.mxu0 %v634_v40  ;;  %572 = vadd.xlane.f32.xlu1 %v571_v51  ;;  %v1938_v51 = vld [vmem:[%s1927_s15 + $0x18] sm:$0xff] }
  0x30   : > { %569 = vadd.xlane.f32.xlu0 %v568_v52  ;;  %v1941_v52 = vld [vmem:[%s1927_s15 + $0x10] sm:$0xff] }
  0x33   : > { %578 = vadd.xlane.f32.xlu1 %v577_v55 }
  0x34   : > { %575 = vadd.xlane.f32.xlu0 %v574_v56 }
  0xa4   : > { %v516_v57 = vpop.xlane.xlu1 %515 }
  0xa5   : > { %v510_v58 = vpop.xlane.xlu0 %509  ;;  %v534_v59 = vadd.f32 1e-06, %v516_v57 }
  0xa6   : > { %v532_v60 = vadd.f32 1e-06, %v510_v58  ;;  %v1946_v58 = vld [vmem:[%s1927_s15 + $0x28] sm:$0xff] }
  0xa7   : > { %1710 = vrsqrt.f32 %v534_v59  ;;  %v1949_v59 = vld [vmem:[%s1927_s15 + $0x20] sm:$0xff] }
  0xa8   : > { %v519_v61 = vpop.xlane.xlu1 %518  ;;  %1712 = vrsqrt.f32 %v532_v60 }
  0xa9   : > { %v513_v62 = vpop.xlane.xlu0 %512  ;;  %v535_v63 = vadd.f32 1e-06, %v519_v61 }
  0xaa   : > { %v533_v0 = vadd.f32 1e-06, %v513_v62 }
  0xab   : > { %1714 = vrsqrt.f32 %v535_v63 }
  0xac   : > { %1716 = vrsqrt.f32 %v533_v0  ;;  %v525_v1 = vpop.xlane.xlu1 %524 }
  0xad   : > { %v522_v2 = vpop.xlane.xlu0 %521  ;;  %v537_v6 = vadd.f32 1e-06, %v525_v1  ;;  %v1954_v1 = vld [vmem:[%s1927_s15 + $0x38] sm:$0xff] }
  0xae   : > { %v536_v7 = vadd.f32 1e-06, %v522_v2  ;;  %v1957_v2 = vld [vmem:[%s1927_s15 + $0x30] sm:$0xff] }
  0xaf   : > { %1718 = vrsqrt.f32 %v537_v6 }
  0xb0   : > { %1720 = vrsqrt.f32 %v536_v7  ;;  %v531_v8 = vpop.xlane.xlu1 %530 }
  0xb1   : > { %v528_v9 = vpop.xlane.xlu0 %527  ;;  %v539_v12 = vadd.f32 1e-06, %v531_v8  ;;  %v1711_v15 = vpop.eup %1710 }
  0xb2   : > { %v538_v14 = vadd.f32 1e-06, %v528_v9  ;;  %v1713_v16 = vpop.eup %1712  ;;  %v598_v19 = vmul.f32 %v1711_v15, %v1845_v3  ;;  %v896_v15 = vld [vmem:[%s2059_s6] sm:$0xff] }
  0xb3   : > { %1722 = vrsqrt.f32 %v539_v12  ;;  %v596_v21 = vmul.f32 %v1713_v16, %v1847_v4 }
  0xb4   : > { %1724 = vrsqrt.f32 %v538_v14 }
  0xb5   : > { %v1715_v17 = vpop.eup %1714  ;;  %v558_v33 = vpop.xlane.xlu0 %557 }
  0xb6   : > { %v1717_v18 = vpop.eup %1716  ;;  %v599_v20 = vmul.f32 %v1715_v17, %v1849_v5  ;;  %v580_v35 = vadd.f32 1e-06, %v558_v33  ;;  %v887_v33 = vld [vmem:[%s477_s26] sm:$0xff] }
  0xb7   : > { %v597_v22 = vmul.f32 %v1717_v18, %v1857_v10 }
  0xb8   : > { %v605_v23 = vpack.c.bf16 %v599_v20, %v598_v19  ;;  %v895_v20 = vld [vmem:[%s2058_s5] sm:$0x3] }
  0xb9   : > { %v1719_v26 = vpop.eup %1718  ;;  %v604_v27 = vpack.c.bf16 %v597_v22, %v596_v21  ;;  %v564_v36 = vpop.xlane.xlu0 %563 }
  0xba   : > { %v1721_v28 = vpop.eup %1720  ;;  %v601_v29 = vmul.f32 %v1719_v26, %v1859_v11  ;;  %v561_v11 = vpop.xlane.xlu1 %560  ;;  %v582_v38 = vadd.f32 1e-06, %v564_v36  ;;  %v893_v36 = vld [vmem:[%s477_s26 + $0x30] sm:$0xff] }
  0xbb   : > { %1569 = vmatprep.mubr.msk.bf16.mxu0 %vm507_vm0, %v604_v27  ;;  %v600_v30 = vmul.f32 %v1721_v28, %v1863_v13  ;;  %v581_v34 = vadd.f32 1e-06, %v561_v11  ;;  %v879_v27 = vld [vmem:[%s465_s23] sm:$0xff]  ;;  %v880_v28 = vld [vmem:[%s465_s23 + $0x8] sm:$0xff]  ;;  %v889_v11 = vld [vmem:[%s477_s26 + $0x10] sm:$0xff] }
  0xbc   : > { %1570 = vmatmul.mubr.msk.bf16.vlgmr.msra.gmra.mrb[0].mxu0 %vm507_vm0, %v605_v23 }
  0xbd   : > { %v1723_v3 = vpop.eup %1722  ;;  %v606_v5 = vpack.c.bf16 %v601_v29, %v600_v30  ;;  %1726 = vrsqrt.f32 %v581_v34  ;;  %v881_v29 = vld [vmem:[%s465_s23 + $0x10] sm:$0xff]  ;;  %v882_v30 = vld [vmem:[%s465_s23 + $0x18] sm:$0xff] }
  0xbe   : > { %v1725_v31 = vpop.eup %1724  ;;  %v603_v4 = vmul.f32 %v1723_v3, %v1877_v24  ;;  %1728 = vrsqrt.f32 %v580_v35  ;;  %v567_v13 = vpop.xlane.xlu1 %566  ;;  %v883_v3 = vld [vmem:[%s465_s23 + $0x20] sm:$0xff]  ;;  %v890_v34 = vld [vmem:[%s477_s26 + $0x18] sm:$0xff] }
  0xbf   : > { %1573 = vmatprep.mubr.msk.bf16.mxu0 %vm507_vm0, %v606_v5  ;;  %v602_v10 = vmul.f32 %v1725_v31, %v1879_v25  ;;  %v583_v37 = vadd.f32 1e-06, %v567_v13  ;;  %v570_v25 = vpop.xlane.xlu0 %569  ;;  %v884_v5 = vld [vmem:[%s465_s23 + $0x28] sm:$0xff]  ;;  %v885_v31 = vld [vmem:[%s465_s23 + $0x30] sm:$0xff]  ;;  %v891_v35 = vld [vmem:[%s477_s26 + $0x20] sm:$0xff] }
  0xc0   : > { %v584_v40 = vadd.f32 1e-06, %v570_v25  ;;  %v892_v13 = vld [vmem:[%s477_s26 + $0x28] sm:$0xff]  ;;  %v711_v25 = vsel %vm709_vm4, %v1930_v41, 0.0 }
  0xc1   : > { %v607_v32 = vpack.c.bf16 %v603_v4, %v602_v10  ;;  %1730 = vrsqrt.f32 %v583_v37  ;;  %v886_v4 = vld [vmem:[%s465_s23 + $0x38] sm:$0xff]  ;;  %v1752_v10 = vmov 0  }
  0xc2   : > { %1732 = vrsqrt.f32 %v582_v38  ;;  %v573_v24 = vpop.xlane.xlu1 %572  ;;  %1709 = vset.pattern.permute.xlu1 %v1752_v10  ;;  %1708 = vset.pattern.permute.xlu0 %v1752_v10  ;;  %v894_v37 = vld [vmem:[%s477_s26 + $0x38] sm:$0xff]  ;;  %v1247_v38 = vld [vmem:[#allocation2] sm:$0x1] }
  0xc3   : > { %v585_v39 = vadd.f32 1e-06, %v573_v24  ;;  %v576_v43 = vpop.xlane.xlu0 %575  ;;  %1163 = vperm.xlu0 %1708, %v887_v33   ;;  %v710_v24 = vsel %vm709_vm4, %v1933_v44, 0.0 }
  0xc4   : > { %1574 = vmatmul.mubr.msk.bf16.gmra.mrb[4].mxu0 %vm507_vm0, %v607_v32  ;;  %v586_v47 = vadd.f32 1e-06, %v576_v43  ;;  %v888_v32 = vld [vmem:[%s477_s26 + $0x8] sm:$0xff]  ;;  %v715_v43 = vsel %vm709_vm4, %v1938_v51, 0.0 }
  0xc5   : > { %1734 = vrsqrt.f32 %v585_v39  ;;  %1168 = vperm.xlu1 %1709, %v888_v32   ;;  %v712_v39 = vadd.f32 %v711_v25, %v710_v24 }
  0xc6   : > { %1736 = vrsqrt.f32 %v584_v40  ;;  %v579_v42 = vpop.xlane.xlu1 %578  ;;  %v713_v40 = vsel %vm709_vm4, %v1941_v52, 0.0 }
  0xc7   : > { %v1727_v45 = vpop.eup %1726  ;;  %v587_v46 = vadd.f32 1e-06, %v579_v42  ;;  %v714_v42 = vadd.f32 %v713_v40, %v712_v39 }
  0xc8   : > { %v1729_v48 = vpop.eup %1728  ;;  %v733_v49 = vmul.f32 %v1727_v45, %v1930_v41  ;;  %v721_v41 = vsel %vm709_vm4, %v1957_v2, 0.0 }
  0xc9   : > { %1738 = vrsqrt.f32 %v587_v46  ;;  %v732_v50 = vmul.f32 %v1729_v48, %v1933_v44  ;;  %1173 = vperm.xlu1 %1709, %v889_v11   ;;  %v716_v45 = vadd.f32 %v715_v43, %v714_v42  ;;  %v717_v46 = vsel %vm709_vm4, %v1949_v59, 0.0 }
  0xca   : > { %1740 = vrsqrt.f32 %v586_v47  ;;  %v719_v48 = vsel %vm709_vm4, %v1946_v58, 0.0 }
  0xcb   : > { %v1731_v53 = vpop.eup %1730  ;;  %v1652_v54 = vpack.c.bf16 %v733_v49, %v732_v50  ;;  %v718_v47 = vadd.f32 %v717_v46, %v716_v45  ;;  %v723_v50 = vsel %vm709_vm4, %v1954_v1, 0.0 }
  0xcc   : > { %v1733_v55 = vpop.eup %1732  ;;  %v735_v56 = vmul.f32 %v1731_v53, %v1938_v51 }
  0xcd   : > { %1653 = vmatprep.subr.bf16.mxu1 %v1652_v54  ;;  %v734_v57 = vmul.f32 %v1733_v55, %v1941_v52  ;;  %1178 = vperm.xlu1 %1709, %v890_v34   ;;  %v720_v44 = vadd.f32 %v719_v48, %v718_v47 }
  0xce   : > { %1655 = vmatpush3.bf16.msra.mxu1 %v1652_v54 }
  0xcf   : > { %v1735_v60 = vpop.eup %1734  ;;  %v1656_v61 = vpack.c.bf16 %v735_v56, %v734_v57  ;;  %v722_v49 = vadd.f32 %v721_v41, %v720_v44 }
  0xd0   : > { %v1737_v62 = vpop.eup %1736  ;;  %v737_v63 = vmul.f32 %v1735_v60, %v1946_v58 }
  0xd1   : > { %1657 = vmatprep.subr.bf16.mxu1 %v1656_v61  ;;  %v736_v0 = vmul.f32 %v1737_v62, %v1949_v59  ;;  %1183 = vperm.xlu1 %1709, %v891_v35   ;;  %v724_v52 = vadd.f32 %v723_v50, %v722_v49 }
  0xd2   : > { %1659 = vmatpush3.bf16.msra.mxu1 %v1656_v61 }
  0xd3   : > { %v1739_v6 = vpop.eup %1738  ;;  %v1660_v7 = vpack.c.bf16 %v737_v63, %v736_v0  ;;  %v725_v53 = vrot.slane %v724_v52, 4 }
  0xd4   : > { %v1741_v8 = vpop.eup %1740  ;;  %v739_v9 = vmul.f32 %v1739_v6, %v1954_v1 }
  0xd5   : > { %1661 = vmatprep.subr.bf16.mxu1 %v1660_v7  ;;  %v738_v12 = vmul.f32 %v1741_v8, %v1957_v2  ;;  %1188 = vperm.xlu1 %1709, %v892_v13   ;;  %v726_v54 = vadd.f32 %v725_v53, %v724_v52 }
  0xd6   : > { %1663 = vmatpush3.bf16.msra.mxu1 %v1660_v7 }
  0xd7   : > { %v1664_v14 = vpack.c.bf16 %v739_v9, %v738_v12  ;;  %v727_v51 = vrot.slane %v726_v54, 2 }
  0xd9   : > { %1665 = vmatprep.subr.bf16.mxu1 %v1664_v14  ;;  %1193 = vperm.xlu1 %1709, %v893_v36   ;;  %v728_v55 = vadd.f32 %v727_v51, %v726_v54 }
  0xda   : > { %1667 = vmatpush3.bf16.msra.mxu1 %v1664_v14 }
  0xdb   : > { %1605 = vmatprep.subr.mxu1 %v896_v15  ;;  %v729_v56 = vrot.slane %v728_v55, 1 }
  0xdd   : > { %1198 = vperm.xlu1 %1709, %v894_v37   ;;  %v730_v57 = vadd.f32 %v729_v56, %v728_v55 }
  0xdf   : > { %v731_v59 = vadd.f32 1e-06, %v730_v57 }
  0xe1   : > { %1250 = vperm.xlu1 %1709, %v1247_v38   ;;  %1742 = vrcp.f32 %v731_v59 }
  0xeb   : > { %v1743_v60 = vpop.eup %1742 }
 0x18f   : > { %v1571_v16 = vpop.f32.mrb[0].mxu0 }
 0x190   : > { %v670_v17 = vpop.f32.mrb[1].mxu0 }
 0x191   : > { %v1572_v18 = vpop.f32.mrb[2].mxu0  ;;  %1593 = vmatprep.mubr.msk.f32.mxu1 %vm740_vm1, %v670_v17 }
 0x192   : > { %v673_v19 = vpop.f32.mrb[3].mxu0 }
 0x193   : > { %1594 = vmatmul.mubr.msk.f32.vlgmr.msra.gmra.mrb[0].mxu1 %vm740_vm1, %v673_v19  ;;  %v1755_v19 = vmov 0.0  }
 0x194   : > { %1596 = vmatprep.mubr.msk.f32.mxu1 %vm740_vm1, %v1571_v16  ;;  %1606 = vmatpush3.msra.mxu1 %v896_v15 }
 0x195   : > { %1619 = vmatprep.subr.msk.mxu1 %vm1051_vm2, %v895_v20  ;;  %1649 = vmatprep.mubr.msk.f32.mxu0 %vm1754_vm5, %v1755_v19 }
 0x197   : > { %v1575_v21 = vpop.f32.mrb[4].mxu0  ;;  %1597 = vmatmul.mubr.msk.f32.gmra.mrb[2].mxu1 %vm740_vm1, %v1572_v18  ;;  %v1753_v18 = vmov 0.0|0.0  }
 0x198   : > { %v686_v22 = vpop.f32.mrb[5].mxu0  ;;  %1668 = vmatprep.subr.bf16.mxu0 %v1753_v18 }
 0x199   : > { %v1576_v23 = vpop.f32.mrb[6].mxu0  ;;  %1599 = vmatprep.mubr.msk.f32.mxu1 %vm740_vm1, %v686_v22 }
 0x19a   : > { %v689_v26 = vpop.f32.mrb[7].mxu0 }
 0x19b   : > { %1600 = vmatmul.mubr.msk.f32.gmra.mrb[4].mxu1 %vm740_vm1, %v689_v26  ;;  %v1495_v26 = vld [vmem:[%s2060_s7] ss:$0 sm:$0xff] }
 0x19c   : > { %1602 = vmatprep.mubr.msk.f32.mxu1 %vm740_vm1, %v1575_v21 }
 0x19f   : > { %1603 = vmatmul.mubr.msk.f32.gmra.mrb[6].mxu1 %vm740_vm1, %v1576_v23 }
 0x1a0   : > { %1607 = vmatprep.mubr.msk.f32.mxu1 %vm897_vm3, %v879_v27  ;;  %v1164_v27 = vpop.permute.xlu0 %1163 }
 0x1a3   : > { %1608 = vmatmul.mubr.msk.f32.vlgmr.msra.gmra.mrb[8].mxu1 %vm897_vm3, %v880_v28 }
 0x1a4   : > { %1620 = vmatpush3.msk.msra.mxu1 %vm1051_vm2, %v895_v20  ;;  %1610 = vmatprep.mubr.msk.f32.mxu1 %vm897_vm3, %v881_v29  ;;  %v1169_v20 = vpop.permute.xlu1 %1168 }
 0x1a5   : > { %v1208_v28 = vmul.f32 %v1495_v26, %v1169_v20 }
 0x1a7   : > { %1611 = vmatmul.mubr.msk.f32.gmra.mrb[10].mxu1 %vm897_vm3, %v882_v30  ;;  %v1207_v30 = vmul.f32 %v1495_v26, %v1164_v27 }
 0x1a8   : > { %1613 = vmatprep.mubr.msk.f32.mxu1 %vm897_vm3, %v883_v3  ;;  %v1174_v21 = vpop.permute.xlu1 %1173 }
 0x1a9   : > { %v1209_v33 = vmul.f32 %v1495_v26, %v1174_v21 }
 0x1ab   : > { %1614 = vmatmul.mubr.msk.f32.gmra.mrb[12].mxu1 %vm897_vm3, %v884_v5  ;;  %v1496_v5 = vld [vmem:[%s2061_s8] ss:$0 sm:$0xff] }
 0x1ac   : > { %1616 = vmatprep.mubr.msk.f32.mxu1 %vm897_vm3, %v885_v31  ;;  %v1179_v22 = vpop.permute.xlu1 %1178 }
 0x1ad   : > { %v1210_v32 = vmul.f32 %v1495_v26, %v1179_v22 }
 0x1af   : > { %1617 = vmatmul.mubr.msk.f32.gmra.mrb[14].mxu1 %vm897_vm3, %v886_v4 }
 0x1b0   : > { %v1184_v23 = vpop.permute.xlu1 %1183 }
 0x1b1   : > { %v1211_v43 = vmul.f32 %v1495_v26, %v1184_v23 }
 0x1b4   : > { %v1189_v29 = vpop.permute.xlu1 %1188 }
 0x1b5   : > { %v1212_v39 = vmul.f32 %v1495_v26, %v1189_v29 }
 0x1b8   : > { %v1194_v34 = vpop.permute.xlu1 %1193 }
 0x1b9   : > { %v1213_v51 = vmul.f32 %v1495_v26, %v1194_v34 }
 0x1bc   : > { %v1199_v49 = vpop.permute.xlu1 %1198 }
 0x1bd   : > { %v1214_v53 = vmul.f32 %v1495_v26, %v1199_v49 }
 0x266   : > { %v1595_v61 = vpop.f32.mrb[0].mxu1 }
 0x267   : > { %v831_v58 = vpop.f32.mrb[1].mxu1  ;;  %v872_v63 = vmul.f32 %v1743_v60, %v1595_v61 }
 0x268   : > { %v871_v62 = vmul.f32 %v1743_v60, %v831_v58 }
 0x26a   : > { %v1598_v0 = vpop.f32.mrb[2].mxu1  ;;  %1621 = vmatprep.mubr.msk.f32.mxu1 %vm709_vm4, %v871_v62 }
 0x26b   : > { %v841_v2 = vpop.f32.mrb[3].mxu1  ;;  %1622 = vmatmul.mubr.msk.f32.vlgmr.msra.gmra.mrb[8].mxu1 %vm709_vm4, %v872_v63  ;;  %v874_v6 = vmul.f32 %v1743_v60, %v1598_v0 }
 0x26c   : > { %v873_v1 = vmul.f32 %v1743_v60, %v841_v2 }
 0x26e   : > { %v1601_v7 = vpop.f32.mrb[4].mxu1  ;;  %1624 = vmatprep.mubr.msk.f32.mxu1 %vm709_vm4, %v873_v1 }
 0x26f   : > { %v876_v8 = vmul.f32 %v1743_v60, %v1601_v7  ;;  %v851_v9 = vpop.f32.mrb[5].mxu1  ;;  %1625 = vmatmul.mubr.msk.f32.gmra.mrb[10].mxu1 %vm709_vm4, %v874_v6 }
 0x270   : > { %v875_v12 = vmul.f32 %v1743_v60, %v851_v9  ;;  %v1253_v9 = vlaneseq }
 0x272   : > { %v1604_v14 = vpop.f32.mrb[6].mxu1  ;;  %1627 = vmatprep.mubr.msk.f32.mxu1 %vm709_vm4, %v875_v12  ;;  %v1254_v12 = vshrl.u32 %v1253_v9, 7 }
 0x273   : > { %v878_v15 = vmul.f32 %v1743_v60, %v1604_v14  ;;  %v861_v16 = vpop.f32.mrb[7].mxu1  ;;  %1628 = vmatmul.mubr.msk.f32.gmra.mrb[12].mxu1 %vm709_vm4, %v876_v8  ;;  %v1246_v8 = vld [vmem:[%s2062_s9] sm:$0x1] }
 0x274   : > { %v877_v17 = vmul.f32 %v1743_v60, %v861_v16  ;;  %v1255_v14 = vsub.s32 0, %v1254_v12 }
 0x276   : > { %1630 = vmatprep.mubr.msk.f32.mxu1 %vm709_vm4, %v877_v17 }
 0x277   : > { %1631 = vmatmul.mubr.msk.f32.gmra.mrb[14].mxu1 %vm709_vm4, %v878_v15  ;;  %v1251_v15 = vpop.permute.xlu1 %1250 }
 0x278   : > { %v1256_v16 = vrot.slane %v1251_v15, %v1255_v14 }
 0x33e   : > { %v1623_v3 = vpop.f32.mrb[8].mxu1 }
 0x33f   : > { %v1216_v31 = vadd.f32 %v1623_v3, %v1208_v28  ;;  %v1121_v4 = vpop.f32.mrb[9].mxu1 }
 0x340   : > { %v1215_v10 = vadd.f32 %v1207_v30, %v1121_v4 }
 0x341   : > { %v1231_v11 = vadd.f32 %v1496_v5, %v1216_v31 }
 0x342   : > { %v1230_v35 = vadd.f32 %v1496_v5, %v1215_v10  ;;  %v1626_v13 = vpop.f32.mrb[10].mxu1 }
 0x343   : > { %v1239_v36 = vmax.f32 %v1231_v11, 0.0  ;;  %v1218_v37 = vadd.f32 %v1626_v13, %v1210_v32  ;;  %v1131_v38 = vpop.f32.mrb[11].mxu1 }
 0x344   : > { %v1238_v24 = vmax.f32 %v1230_v35, 0.0  ;;  %v1217_v25 = vadd.f32 %v1209_v33, %v1131_v38 }
 0x345   : > { %v1233_v40 = vadd.f32 %v1496_v5, %v1218_v37 }
 0x346   : > { %v1669_v45 = vpack.c.bf16 %v1239_v36, %v1238_v24  ;;  %v1232_v46 = vadd.f32 %v1496_v5, %v1217_v25  ;;  %v1629_v47 = vpop.f32.mrb[12].mxu1 }
 0x347   : > { %v1241_v48 = vmax.f32 %v1233_v40, 0.0  ;;  %v1220_v44 = vadd.f32 %v1629_v47, %v1212_v39  ;;  %v1141_v41 = vpop.f32.mrb[13].mxu1 }
 0x348   : > { %v1240_v50 = vmax.f32 %v1232_v46, 0.0  ;;  %v1219_v52 = vadd.f32 %v1211_v43, %v1141_v41  ;;  %1671 = vmatpush3.bf16.xpose.msk.msra.mxu0 %vm2026_vm6, %v1669_v45 }
 0x349   : > { %v1235_v54 = vadd.f32 %v1496_v5, %v1220_v44  ;;  %1672 = vmatprep.subr.bf16.mxu0 %v1753_v18 }
 0x34a   : > { %v1673_v55 = vpack.c.bf16 %v1241_v48, %v1240_v50  ;;  %v1234_v56 = vadd.f32 %v1496_v5, %v1219_v52  ;;  %v1632_v57 = vpop.f32.mrb[14].mxu1 }
 0x34b   : > { %v1243_v59 = vmax.f32 %v1235_v54, 0.0  ;;  %v1222_v60 = vadd.f32 %v1632_v57, %v1214_v53  ;;  %v1151_v61 = vpop.f32.mrb[15].mxu1 }
 0x34c   : > { %v1242_v58 = vmax.f32 %v1234_v56, 0.0  ;;  %v1221_v62 = vadd.f32 %v1213_v51, %v1151_v61 }
 0x34d   : > { %v1237_v63 = vadd.f32 %v1496_v5, %v1222_v60 }
 0x34e   : > { %v1677_v0 = vpack.c.bf16 %v1243_v59, %v1242_v58  ;;  %v1236_v2 = vadd.f32 %v1496_v5, %v1221_v62 }
 0x34f   : > { %v1245_v1 = vmax.f32 %v1237_v63, 0.0 }
 0x350   : > { %v1244_v6 = vmax.f32 %v1236_v2, 0.0  ;;  %1675 = vmatpush3.bf16.xpose.msk.msra.mxu0 %vm2026_vm6, %v1673_v55 }
 0x351   : > { %1676 = vmatprep.subr.bf16.mxu0 %v1753_v18 }
 0x352   : > { %v1681_v7 = vpack.c.bf16 %v1245_v1, %v1244_v6 }
 0x358   : > { %1679 = vmatpush3.bf16.xpose.msk.msra.mxu0 %vm2026_vm6, %v1677_v0 }
 0x359   : > { %1680 = vmatprep.subr.bf16.mxu0 %v1753_v18 }
 0x360   : > { %1683 = vmatpush3.bf16.xpose.msk.msra.mxu0 %vm2026_vm6, %v1681_v7 }
 0x367   : > { %1650 = vmatmul.mubr.msk.f32.vlgmr.msra.gmra.mrb[8].mxu0 %vm507_vm0, %v1246_v8 }
 0x43a   : > { %v1350_v17 = vpop.f32.mrb[8].mxu0 }
 0x43b   : > { %v1351_v18 = vadd.f32 %v1350_v17, %v1256_v16  ;;  %v1651_v19 = vpop.f32.mrb[9].mxu0 }
 0x43d   : > { %1355 = vst.msk [vmem:[%s481_s16] sm:$0x1] %vm1354_vm7, %v1351_v18 }
 0x43e PF: > { %s23_s19 = sadd.s32 1, %s1750_s19  }
 0x43f   : > { %p20_p7 = scmp.ge.s32.totalorder %s23_s19, 4  }
 0x441   :  { %22 = sbr.rel (!%p20_p7) target bundleno = 3 (0x3), region = 106 }

</bundles_post_ra>
